<compile_context>
chip_gen: v6e
topology: v6e:2x2x1
jax: 0.10.0
libtpu: 0.0.40
codegen_flags: <defaults>
</compile_context>

<pallas_src>
import functools

import jax
import jax.numpy as jnp
from jax.experimental import pallas as pl
from jax.experimental.pallas import tpu as pltpu

NEG_SLOPE = 0.2


def _leaky(x):
    return jnp.where(x > 0, x, NEG_SLOPE * x)


def _sigmoid(x):
    return 1.0 / (1.0 + jnp.exp(-x))


# ----------------------------------------------------------------------------
# Fused Pallas kernel: proj1 -> GRU1 -> proj2 -> GRU2 -> (+ proj3 residual)
# ----------------------------------------------------------------------------
def crazy_rnn_seq_decoder_kernel(
        code_ref,                                  # (B, C)
        p1w_ref, p1b_ref,                          # (C, C), (1, C)
        p2w_ref, p2b_ref,                          # (C, E), (1, E)
        wih1_ref, whh1_ref, bih1_ref, bhh1_ref,    # (C,3C), (C,3C), (1,3C), (1,3C)
        wih2_ref, whh2_ref, bih2_ref, bhh2_ref,    # (C,3E), (E,3E), (1,3E), (1,3E)
        p3w_ref, p3b_ref,                          # (T*C, T*E), (1, T*E)
        out_ref,                                   # (T, B, E)
        *, seq_length, code_size, emb_size):
    T, C, E = seq_length, code_size, emb_size

    def mm(a, b):   # MXU matmul, f32 accumulate
        return jnp.dot(a, b, preferred_element_type=jnp.float32)

    code = code_ref[...]                                         # (B, C)

    # proj1 -> initial hidden of GRU1
    h1 = _leaky(mm(code, p1w_ref[...]) + p1b_ref[...])           # (B, C)

    # GRU1 input gates are identical at every step (input = code.expand)
    gx1 = mm(code, wih1_ref[...]) + bih1_ref[...]                # (B, 3C)
    whh1, bhh1 = whh1_ref[...], bhh1_ref[...]
    wih2, bih2 = wih2_ref[...], bih2_ref[...]

    h1_steps, gx2_steps = [], []
    for _ in range(T):                                           # GRU1 recurrence
        gh = mm(h1, whh1) + bhh1                                 # (B, 3C)
        r = _sigmoid(gx1[:, :C]       + gh[:, :C])
        z = _sigmoid(gx1[:, C:2 * C]  + gh[:, C:2 * C])
        n = jnp.tanh(gx1[:, 2 * C:]   + r * gh[:, 2 * C:])
        h1 = (1.0 - z) * n + z * h1
        h1_steps.append(h1)
        gx2_steps.append(mm(h1, wih2) + bih2)                    # GRU2 input gates

    # proj3 on H.permute(1,0,2).reshape(B, T*C): one wide matmul
    h_flat = jnp.concatenate(h1_steps, axis=1)                   # (B, T*C)
    res3 = mm(h_flat, p3w_ref[...]) + p3b_ref[...]               # (B, T*E)

    # proj2 on final GRU1 hidden -> initial hidden of GRU2
    h2 = _leaky(mm(h1, p2w_ref[...]) + p2b_ref[...])             # (B, E)
    whh2, bhh2 = whh2_ref[...], bhh2_ref[...]

    for t in range(T):                                           # GRU2 recurrence
        gh = mm(h2, whh2) + bhh2                                 # (B, 3E)
        gx = gx2_steps[t]
        r = _sigmoid(gx[:, :E]       + gh[:, :E])
        z = _sigmoid(gx[:, E:2 * E]  + gh[:, E:2 * E])
        n = jnp.tanh(gx[:, 2 * E:]   + r * gh[:, 2 * E:])
        h2 = (1.0 - z) * n + z * h2
        out_ref[t] = (h2 + res3[:, t * E:(t + 1) * E]).astype(out_ref.dtype)


# ----------------------------------------------------------------------------
# Wrapper: pre-transpose weights (no in-kernel .T), single pallas_call
# ----------------------------------------------------------------------------
def crazy_rnn_seq_decoder(params, code, *, seq_length):
    _, B, C = code.shape
    E = params["proj2_w"].shape[0]
    T = seq_length

    args = (
        code.reshape(B, C).astype(jnp.float32),
        params["proj1_w"].T, params["proj1_b"].reshape(1, C),
        params["proj2_w"].T, params["proj2_b"].reshape(1, E),
        params["gru1_wih"].T, params["gru1_whh"].T,
        params["gru1_bih"].reshape(1, 3 * C), params["gru1_bhh"].reshape(1, 3 * C),
        params["gru2_wih"].T, params["gru2_whh"].T,
        params["gru2_bih"].reshape(1, 3 * E), params["gru2_bhh"].reshape(1, 3 * E),
        params["proj3_w"].T, params["proj3_b"].reshape(1, T * E),
    )
    kern = functools.partial(crazy_rnn_seq_decoder_kernel,
                             seq_length=T, code_size=C, emb_size=E)
    vmem_spec = pl.BlockSpec(memory_space=pltpu.MemorySpace.VMEM)
    return pl.pallas_call(
        kern,
        in_specs=[vmem_spec] * len(args),
        out_specs=vmem_spec,
        out_shape=jax.ShapeDtypeStruct((T, B, E), jnp.float32),
    )(*args)


# ----------------------------------------------------------------------------
# Pure-JAX reference (same math, HIGHEST-precision matmuls) for verification
# ----------------------------------------------------------------------------
def reference_forward(params, code, *, seq_length):
    T = seq_length
    x = code[0]                                                  # (B, C)
    C = x.shape[1]
    E = params["proj2_w"].shape[0]
    hp = functools.partial(jnp.dot, precision=jax.lax.Precision.HIGHEST)

    def lin(v, w, b):
        return hp(v, w.T) + b

    def gru_cell(xt, h, wih, whh, bih, bhh, H):
        gi = hp(xt, wih.T) + bih
        gh = hp(h, whh.T) + bhh
        r = _sigmoid(gi[:, :H] + gh[:, :H])
        z = _sigmoid(gi[:, H:2 * H] + gh[:, H:2 * H])
        n = jnp.tanh(gi[:, 2 * H:] + r * gh[:, 2 * H:])
        return (1.0 - z) * n + z * h

    h1 = _leaky(lin(x, params["proj1_w"], params["proj1_b"]))
    H_list = []
    for _ in range(T):
        h1 = gru_cell(x, h1, params["gru1_wih"], params["gru1_whh"],
                      params["gru1_bih"], params["gru1_bhh"], C)
        H_list.append(h1)
    H = jnp.stack(H_list, axis=0)                                # (T, B, C)

    h2 = _leaky(lin(h1, params["proj2_w"], params["proj2_b"]))
    X_list = []
    for t in range(T):
        h2 = gru_cell(H[t], h2, params["gru2_wih"], params["gru2_whh"],
                      params["gru2_bih"], params["gru2_bhh"], E)
        X_list.append(h2)
    X = jnp.stack(X_list, axis=0)                                # (T, B, E)

    B = x.shape[0]
    Hf = jnp.transpose(H, (1, 0, 2)).reshape(B, T * C)
    P = lin(Hf, params["proj3_w"], params["proj3_b"]).reshape(B, T, E)
    return X + jnp.transpose(P, (1, 0, 2))


# ----------------------------------------------------------------------------
# Deterministic parameter init (PyTorch-default-style uniform)
# ----------------------------------------------------------------------------
def _uniform(key, shape, bound):
    return jax.random.uniform(key, shape, jnp.float32, -bound, bound)


def init_params(key, emb_size, code_size, seq_length):
    C, E, T = code_size, emb_size, seq_length
    ks = iter(jax.random.split(key, 16))
    p = {}
    b = 1.0 / C ** 0.5
    p["proj1_w"] = _uniform(next(ks), (C, C), b)
    p["proj1_b"] = _uniform(next(ks), (C,), b)
    p["proj2_w"] = _uniform(next(ks), (E, C), b)
    p["proj2_b"] = _uniform(next(ks), (E,), b)
    b3 = 1.0 / (T * C) ** 0.5
    p["proj3_w"] = _uniform(next(ks), (T * E, T * C), b3)
    p["proj3_b"] = _uniform(next(ks), (T * E,), b3)
    bg1 = 1.0 / C ** 0.5
    p["gru1_wih"] = _uniform(next(ks), (3 * C, C), bg1)
    p["gru1_whh"] = _uniform(next(ks), (3 * C, C), bg1)
    p["gru1_bih"] = _uniform(next(ks), (3 * C,), bg1)
    p["gru1_bhh"] = _uniform(next(ks), (3 * C,), bg1)
    bg2 = 1.0 / E ** 0.5
    p["gru2_wih"] = _uniform(next(ks), (3 * E, C), bg2)
    p["gru2_whh"] = _uniform(next(ks), (3 * E, E), bg2)
    p["gru2_bih"] = _uniform(next(ks), (3 * E,), bg2)
    p["gru2_bhh"] = _uniform(next(ks), (3 * E,), bg2)
    return p


if __name__ == "__main__":
    B = 2
    emb_size = 8
    code_size = 16
    seq_length = 8

    key = jax.random.PRNGKey(0)
    kc, kp = jax.random.split(key)
    code = jax.random.normal(kc, (1, B, code_size), dtype=jnp.float32)
    params = init_params(kp, emb_size, code_size, seq_length)

    fwd = jax.jit(functools.partial(crazy_rnn_seq_decoder, seq_length=seq_length))
    out = fwd(params, code)
    jax.block_until_ready(out)

    assert out.shape == (seq_length, B, emb_size), out.shape
    assert out.dtype == jnp.float32

    ref = reference_forward(params, code, seq_length=seq_length)
    max_err = float(jnp.max(jnp.abs(out - ref)))
    assert jnp.allclose(out, ref, atol=2e-3, rtol=2e-3), max_err
    print("KERNEL_OK")
</pallas_src>

<mosaic_0001>
module attributes {stable_mosaic.version = 11 : i64} {
  func.func @crazy_rnn_seq_decoder_kernel(%arg0: memref<2x16xf32, #tpu.memory_space<vmem>>, %arg1: memref<16x16xf32, #tpu.memory_space<vmem>>, %arg2: memref<1x16xf32, #tpu.memory_space<vmem>>, %arg3: memref<16x8xf32, #tpu.memory_space<vmem>>, %arg4: memref<1x8xf32, #tpu.memory_space<vmem>>, %arg5: memref<16x48xf32, #tpu.memory_space<vmem>>, %arg6: memref<16x48xf32, #tpu.memory_space<vmem>>, %arg7: memref<1x48xf32, #tpu.memory_space<vmem>>, %arg8: memref<1x48xf32, #tpu.memory_space<vmem>>, %arg9: memref<16x24xf32, #tpu.memory_space<vmem>>, %arg10: memref<8x24xf32, #tpu.memory_space<vmem>>, %arg11: memref<1x24xf32, #tpu.memory_space<vmem>>, %arg12: memref<1x24xf32, #tpu.memory_space<vmem>>, %arg13: memref<128x64xf32, #tpu.memory_space<vmem>>, %arg14: memref<1x64xf32, #tpu.memory_space<vmem>>, %arg15: memref<8x2x8xf32, #tpu.memory_space<vmem>>) attributes {dimension_semantics = [], scalar_prefetch = 0 : i64, scratch_operands = 0 : i64, tpu.core_type = #tpu.core_type<tc>} {
    %c0 = arith.constant 0 : index
    %c0_0 = arith.constant 0 : index
    %0 = vector.load %arg0[%c0, %c0_0] : memref<2x16xf32, #tpu.memory_space<vmem>>, vector<2x16xf32>
    %c0_1 = arith.constant 0 : index
    %c0_2 = arith.constant 0 : index
    %1 = vector.load %arg1[%c0_1, %c0_2] : memref<16x16xf32, #tpu.memory_space<vmem>>, vector<16x16xf32>
    %cst = arith.constant dense<0.000000e+00> : vector<2x16xf32>
    %2 = tpu.matmul %0, %1, %cst {dimension_numbers = #tpu.dot_dimension_numbers<[1], [0], [0], [1], [0, 0, 1, 1], [], []>} : vector<2x16xf32>, vector<16x16xf32>, vector<2x16xf32> -> vector<2x16xf32>
    %c0_3 = arith.constant 0 : index
    %c0_4 = arith.constant 0 : index
    %3 = vector.load %arg2[%c0_3, %c0_4] : memref<1x16xf32, #tpu.memory_space<vmem>>, vector<1x16xf32>
    %4 = vector.broadcast %3 : vector<1x16xf32> to vector<2x16xf32>
    %5 = arith.addf %2, %4 : vector<2x16xf32>
    %cst_5 = arith.constant 0.000000e+00 : f32
    %6 = vector.broadcast %cst_5 : f32 to vector<2x16xf32>
    %7 = arith.cmpf ogt, %5, %6 : vector<2x16xf32>
    %cst_6 = arith.constant 2.000000e-01 : f32
    %8 = vector.broadcast %cst_6 : f32 to vector<2x16xf32>
    %9 = arith.mulf %8, %5 : vector<2x16xf32>
    %10 = arith.select %7, %5, %9 : vector<2x16xi1>, vector<2x16xf32>
    %c0_7 = arith.constant 0 : index
    %c0_8 = arith.constant 0 : index
    %11 = vector.load %arg5[%c0_7, %c0_8] : memref<16x48xf32, #tpu.memory_space<vmem>>, vector<16x48xf32>
    %cst_9 = arith.constant dense<0.000000e+00> : vector<2x48xf32>
    %12 = tpu.matmul %0, %11, %cst_9 {dimension_numbers = #tpu.dot_dimension_numbers<[1], [0], [0], [1], [0, 0, 1, 1], [], []>} : vector<2x16xf32>, vector<16x48xf32>, vector<2x48xf32> -> vector<2x48xf32>
    %c0_10 = arith.constant 0 : index
    %c0_11 = arith.constant 0 : index
    %13 = vector.load %arg7[%c0_10, %c0_11] : memref<1x48xf32, #tpu.memory_space<vmem>>, vector<1x48xf32>
    %14 = vector.broadcast %13 : vector<1x48xf32> to vector<2x48xf32>
    %15 = arith.addf %12, %14 : vector<2x48xf32>
    %c0_12 = arith.constant 0 : index
    %c0_13 = arith.constant 0 : index
    %16 = vector.load %arg6[%c0_12, %c0_13] : memref<16x48xf32, #tpu.memory_space<vmem>>, vector<16x48xf32>
    %c0_14 = arith.constant 0 : index
    %c0_15 = arith.constant 0 : index
    %17 = vector.load %arg8[%c0_14, %c0_15] : memref<1x48xf32, #tpu.memory_space<vmem>>, vector<1x48xf32>
    %c0_16 = arith.constant 0 : index
    %c0_17 = arith.constant 0 : index
    %18 = vector.load %arg9[%c0_16, %c0_17] : memref<16x24xf32, #tpu.memory_space<vmem>>, vector<16x24xf32>
    %c0_18 = arith.constant 0 : index
    %c0_19 = arith.constant 0 : index
    %19 = vector.load %arg11[%c0_18, %c0_19] : memref<1x24xf32, #tpu.memory_space<vmem>>, vector<1x24xf32>
    %cst_20 = arith.constant dense<0.000000e+00> : vector<2x48xf32>
    %20 = tpu.matmul %10, %16, %cst_20 {dimension_numbers = #tpu.dot_dimension_numbers<[1], [0], [0], [1], [0, 0, 1, 1], [], []>} : vector<2x16xf32>, vector<16x48xf32>, vector<2x48xf32> -> vector<2x48xf32>
    %21 = vector.broadcast %17 : vector<1x48xf32> to vector<2x48xf32>
    %22 = arith.addf %20, %21 : vector<2x48xf32>
    %23 = vector.extract_strided_slice %15 {offsets = [0, 0], sizes = [2, 16], strides = [1, 1]} : vector<2x48xf32> to vector<2x16xf32>
    %24 = vector.extract_strided_slice %22 {offsets = [0, 0], sizes = [2, 16], strides = [1, 1]} : vector<2x48xf32> to vector<2x16xf32>
    %25 = arith.addf %23, %24 : vector<2x16xf32>
    %cst_21 = arith.constant 0.000000e+00 : f32
    %26 = vector.broadcast %cst_21 : f32 to vector<2x16xf32>
    %27 = arith.subf %26, %25 : vector<2x16xf32>
    %28 = math.exp %27 : vector<2x16xf32>
    %cst_22 = arith.constant 1.000000e+00 : f32
    %29 = vector.broadcast %cst_22 : f32 to vector<2x16xf32>
    %30 = arith.addf %29, %28 : vector<2x16xf32>
    %cst_23 = arith.constant 1.000000e+00 : f32
    %31 = vector.broadcast %cst_23 : f32 to vector<2x16xf32>
    %32 = arith.divf %31, %30 : vector<2x16xf32>
    %33 = vector.extract_strided_slice %15 {offsets = [0, 16], sizes = [2, 16], strides = [1, 1]} : vector<2x48xf32> to vector<2x16xf32>
    %34 = vector.extract_strided_slice %22 {offsets = [0, 16], sizes = [2, 16], strides = [1, 1]} : vector<2x48xf32> to vector<2x16xf32>
    %35 = arith.addf %33, %34 : vector<2x16xf32>
    %cst_24 = arith.constant 0.000000e+00 : f32
    %36 = vector.broadcast %cst_24 : f32 to vector<2x16xf32>
    %37 = arith.subf %36, %35 : vector<2x16xf32>
    %38 = math.exp %37 : vector<2x16xf32>
    %cst_25 = arith.constant 1.000000e+00 : f32
    %39 = vector.broadcast %cst_25 : f32 to vector<2x16xf32>
    %40 = arith.addf %39, %38 : vector<2x16xf32>
    %cst_26 = arith.constant 1.000000e+00 : f32
    %41 = vector.broadcast %cst_26 : f32 to vector<2x16xf32>
    %42 = arith.divf %41, %40 : vector<2x16xf32>
    %43 = vector.extract_strided_slice %15 {offsets = [0, 32], sizes = [2, 16], strides = [1, 1]} : vector<2x48xf32> to vector<2x16xf32>
    %44 = vector.extract_strided_slice %22 {offsets = [0, 32], sizes = [2, 16], strides = [1, 1]} : vector<2x48xf32> to vector<2x16xf32>
    %45 = arith.mulf %32, %44 : vector<2x16xf32>
    %46 = arith.addf %43, %45 : vector<2x16xf32>
    %47 = math.tanh %46 : vector<2x16xf32>
    %cst_27 = arith.constant 1.000000e+00 : f32
    %48 = vector.broadcast %cst_27 : f32 to vector<2x16xf32>
    %49 = arith.subf %48, %42 : vector<2x16xf32>
    %50 = arith.mulf %49, %47 : vector<2x16xf32>
    %51 = arith.mulf %42, %10 : vector<2x16xf32>
    %52 = arith.addf %50, %51 : vector<2x16xf32>
    %cst_28 = arith.constant dense<0.000000e+00> : vector<2x24xf32>
    %53 = tpu.matmul %52, %18, %cst_28 {dimension_numbers = #tpu.dot_dimension_numbers<[1], [0], [0], [1], [0, 0, 1, 1], [], []>} : vector<2x16xf32>, vector<16x24xf32>, vector<2x24xf32> -> vector<2x24xf32>
    %54 = vector.broadcast %19 : vector<1x24xf32> to vector<2x24xf32>
    %55 = arith.addf %53, %54 : vector<2x24xf32>
    %cst_29 = arith.constant dense<0.000000e+00> : vector<2x48xf32>
    %56 = tpu.matmul %52, %16, %cst_29 {dimension_numbers = #tpu.dot_dimension_numbers<[1], [0], [0], [1], [0, 0, 1, 1], [], []>} : vector<2x16xf32>, vector<16x48xf32>, vector<2x48xf32> -> vector<2x48xf32>
    %57 = vector.broadcast %17 : vector<1x48xf32> to vector<2x48xf32>
    %58 = arith.addf %56, %57 : vector<2x48xf32>
    %59 = vector.extract_strided_slice %15 {offsets = [0, 0], sizes = [2, 16], strides = [1, 1]} : vector<2x48xf32> to vector<2x16xf32>
    %60 = vector.extract_strided_slice %58 {offsets = [0, 0], sizes = [2, 16], strides = [1, 1]} : vector<2x48xf32> to vector<2x16xf32>
    %61 = arith.addf %59, %60 : vector<2x16xf32>
    %cst_30 = arith.constant 0.000000e+00 : f32
    %62 = vector.broadcast %cst_30 : f32 to vector<2x16xf32>
    %63 = arith.subf %62, %61 : vector<2x16xf32>
    %64 = math.exp %63 : vector<2x16xf32>
    %cst_31 = arith.constant 1.000000e+00 : f32
    %65 = vector.broadcast %cst_31 : f32 to vector<2x16xf32>
    %66 = arith.addf %65, %64 : vector<2x16xf32>
    %cst_32 = arith.constant 1.000000e+00 : f32
    %67 = vector.broadcast %cst_32 : f32 to vector<2x16xf32>
    %68 = arith.divf %67, %66 : vector<2x16xf32>
    %69 = vector.extract_strided_slice %15 {offsets = [0, 16], sizes = [2, 16], strides = [1, 1]} : vector<2x48xf32> to vector<2x16xf32>
    %70 = vector.extract_strided_slice %58 {offsets = [0, 16], sizes = [2, 16], strides = [1, 1]} : vector<2x48xf32> to vector<2x16xf32>
    %71 = arith.addf %69, %70 : vector<2x16xf32>
    %cst_33 = arith.constant 0.000000e+00 : f32
    %72 = vector.broadcast %cst_33 : f32 to vector<2x16xf32>
    %73 = arith.subf %72, %71 : vector<2x16xf32>
    %74 = math.exp %73 : vector<2x16xf32>
    %cst_34 = arith.constant 1.000000e+00 : f32
    %75 = vector.broadcast %cst_34 : f32 to vector<2x16xf32>
    %76 = arith.addf %75, %74 : vector<2x16xf32>
    %cst_35 = arith.constant 1.000000e+00 : f32
    %77 = vector.broadcast %cst_35 : f32 to vector<2x16xf32>
    %78 = arith.divf %77, %76 : vector<2x16xf32>
    %79 = vector.extract_strided_slice %15 {offsets = [0, 32], sizes = [2, 16], strides = [1, 1]} : vector<2x48xf32> to vector<2x16xf32>
    %80 = vector.extract_strided_slice %58 {offsets = [0, 32], sizes = [2, 16], strides = [1, 1]} : vector<2x48xf32> to vector<2x16xf32>
    %81 = arith.mulf %68, %80 : vector<2x16xf32>
    %82 = arith.addf %79, %81 : vector<2x16xf32>
    %83 = math.tanh %82 : vector<2x16xf32>
    %cst_36 = arith.constant 1.000000e+00 : f32
    %84 = vector.broadcast %cst_36 : f32 to vector<2x16xf32>
    %85 = arith.subf %84, %78 : vector<2x16xf32>
    %86 = arith.mulf %85, %83 : vector<2x16xf32>
    %87 = arith.mulf %78, %52 : vector<2x16xf32>
    %88 = arith.addf %86, %87 : vector<2x16xf32>
    %cst_37 = arith.constant dense<0.000000e+00> : vector<2x24xf32>
    %89 = tpu.matmul %88, %18, %cst_37 {dimension_numbers = #tpu.dot_dimension_numbers<[1], [0], [0], [1], [0, 0, 1, 1], [], []>} : vector<2x16xf32>, vector<16x24xf32>, vector<2x24xf32> -> vector<2x24xf32>
    %90 = vector.broadcast %19 : vector<1x24xf32> to vector<2x24xf32>
    %91 = arith.addf %89, %90 : vector<2x24xf32>
    %cst_38 = arith.constant dense<0.000000e+00> : vector<2x48xf32>
    %92 = tpu.matmul %88, %16, %cst_38 {dimension_numbers = #tpu.dot_dimension_numbers<[1], [0], [0], [1], [0, 0, 1, 1], [], []>} : vector<2x16xf32>, vector<16x48xf32>, vector<2x48xf32> -> vector<2x48xf32>
    %93 = vector.broadcast %17 : vector<1x48xf32> to vector<2x48xf32>
    %94 = arith.addf %92, %93 : vector<2x48xf32>
    %95 = vector.extract_strided_slice %15 {offsets = [0, 0], sizes = [2, 16], strides = [1, 1]} : vector<2x48xf32> to vector<2x16xf32>
    %96 = vector.extract_strided_slice %94 {offsets = [0, 0], sizes = [2, 16], strides = [1, 1]} : vector<2x48xf32> to vector<2x16xf32>
    %97 = arith.addf %95, %96 : vector<2x16xf32>
    %cst_39 = arith.constant 0.000000e+00 : f32
    %98 = vector.broadcast %cst_39 : f32 to vector<2x16xf32>
    %99 = arith.subf %98, %97 : vector<2x16xf32>
    %100 = math.exp %99 : vector<2x16xf32>
    %cst_40 = arith.constant 1.000000e+00 : f32
    %101 = vector.broadcast %cst_40 : f32 to vector<2x16xf32>
    %102 = arith.addf %101, %100 : vector<2x16xf32>
    %cst_41 = arith.constant 1.000000e+00 : f32
    %103 = vector.broadcast %cst_41 : f32 to vector<2x16xf32>
    %104 = arith.divf %103, %102 : vector<2x16xf32>
    %105 = vector.extract_strided_slice %15 {offsets = [0, 16], sizes = [2, 16], strides = [1, 1]} : vector<2x48xf32> to vector<2x16xf32>
    %106 = vector.extract_strided_slice %94 {offsets = [0, 16], sizes = [2, 16], strides = [1, 1]} : vector<2x48xf32> to vector<2x16xf32>
    %107 = arith.addf %105, %106 : vector<2x16xf32>
    %cst_42 = arith.constant 0.000000e+00 : f32
    %108 = vector.broadcast %cst_42 : f32 to vector<2x16xf32>
    %109 = arith.subf %108, %107 : vector<2x16xf32>
    %110 = math.exp %109 : vector<2x16xf32>
    %cst_43 = arith.constant 1.000000e+00 : f32
    %111 = vector.broadcast %cst_43 : f32 to vector<2x16xf32>
    %112 = arith.addf %111, %110 : vector<2x16xf32>
    %cst_44 = arith.constant 1.000000e+00 : f32
    %113 = vector.broadcast %cst_44 : f32 to vector<2x16xf32>
    %114 = arith.divf %113, %112 : vector<2x16xf32>
    %115 = vector.extract_strided_slice %15 {offsets = [0, 32], sizes = [2, 16], strides = [1, 1]} : vector<2x48xf32> to vector<2x16xf32>
    %116 = vector.extract_strided_slice %94 {offsets = [0, 32], sizes = [2, 16], strides = [1, 1]} : vector<2x48xf32> to vector<2x16xf32>
    %117 = arith.mulf %104, %116 : vector<2x16xf32>
    %118 = arith.addf %115, %117 : vector<2x16xf32>
    %119 = math.tanh %118 : vector<2x16xf32>
    %cst_45 = arith.constant 1.000000e+00 : f32
    %120 = vector.broadcast %cst_45 : f32 to vector<2x16xf32>
    %121 = arith.subf %120, %114 : vector<2x16xf32>
    %122 = arith.mulf %121, %119 : vector<2x16xf32>
    %123 = arith.mulf %114, %88 : vector<2x16xf32>
    %124 = arith.addf %122, %123 : vector<2x16xf32>
    %cst_46 = arith.constant dense<0.000000e+00> : vector<2x24xf32>
    %125 = tpu.matmul %124, %18, %cst_46 {dimension_numbers = #tpu.dot_dimension_numbers<[1], [0], [0], [1], [0, 0, 1, 1], [], []>} : vector<2x16xf32>, vector<16x24xf32>, vector<2x24xf32> -> vector<2x24xf32>
    %126 = vector.broadcast %19 : vector<1x24xf32> to vector<2x24xf32>
    %127 = arith.addf %125, %126 : vector<2x24xf32>
    %cst_47 = arith.constant dense<0.000000e+00> : vector<2x48xf32>
    %128 = tpu.matmul %124, %16, %cst_47 {dimension_numbers = #tpu.dot_dimension_numbers<[1], [0], [0], [1], [0, 0, 1, 1], [], []>} : vector<2x16xf32>, vector<16x48xf32>, vector<2x48xf32> -> vector<2x48xf32>
    %129 = vector.broadcast %17 : vector<1x48xf32> to vector<2x48xf32>
    %130 = arith.addf %128, %129 : vector<2x48xf32>
    %131 = vector.extract_strided_slice %15 {offsets = [0, 0], sizes = [2, 16], strides = [1, 1]} : vector<2x48xf32> to vector<2x16xf32>
    %132 = vector.extract_strided_slice %130 {offsets = [0, 0], sizes = [2, 16], strides = [1, 1]} : vector<2x48xf32> to vector<2x16xf32>
    %133 = arith.addf %131, %132 : vector<2x16xf32>
    %cst_48 = arith.constant 0.000000e+00 : f32
    %134 = vector.broadcast %cst_48 : f32 to vector<2x16xf32>
    %135 = arith.subf %134, %133 : vector<2x16xf32>
    %136 = math.exp %135 : vector<2x16xf32>
    %cst_49 = arith.constant 1.000000e+00 : f32
    %137 = vector.broadcast %cst_49 : f32 to vector<2x16xf32>
    %138 = arith.addf %137, %136 : vector<2x16xf32>
    %cst_50 = arith.constant 1.000000e+00 : f32
    %139 = vector.broadcast %cst_50 : f32 to vector<2x16xf32>
    %140 = arith.divf %139, %138 : vector<2x16xf32>
    %141 = vector.extract_strided_slice %15 {offsets = [0, 16], sizes = [2, 16], strides = [1, 1]} : vector<2x48xf32> to vector<2x16xf32>
    %142 = vector.extract_strided_slice %130 {offsets = [0, 16], sizes = [2, 16], strides = [1, 1]} : vector<2x48xf32> to vector<2x16xf32>
    %143 = arith.addf %141, %142 : vector<2x16xf32>
    %cst_51 = arith.constant 0.000000e+00 : f32
    %144 = vector.broadcast %cst_51 : f32 to vector<2x16xf32>
    %145 = arith.subf %144, %143 : vector<2x16xf32>
    %146 = math.exp %145 : vector<2x16xf32>
    %cst_52 = arith.constant 1.000000e+00 : f32
    %147 = vector.broadcast %cst_52 : f32 to vector<2x16xf32>
    %148 = arith.addf %147, %146 : vector<2x16xf32>
    %cst_53 = arith.constant 1.000000e+00 : f32
    %149 = vector.broadcast %cst_53 : f32 to vector<2x16xf32>
    %150 = arith.divf %149, %148 : vector<2x16xf32>
    %151 = vector.extract_strided_slice %15 {offsets = [0, 32], sizes = [2, 16], strides = [1, 1]} : vector<2x48xf32> to vector<2x16xf32>
    %152 = vector.extract_strided_slice %130 {offsets = [0, 32], sizes = [2, 16], strides = [1, 1]} : vector<2x48xf32> to vector<2x16xf32>
    %153 = arith.mulf %140, %152 : vector<2x16xf32>
    %154 = arith.addf %151, %153 : vector<2x16xf32>
    %155 = math.tanh %154 : vector<2x16xf32>
    %cst_54 = arith.constant 1.000000e+00 : f32
    %156 = vector.broadcast %cst_54 : f32 to vector<2x16xf32>
    %157 = arith.subf %156, %150 : vector<2x16xf32>
    %158 = arith.mulf %157, %155 : vector<2x16xf32>
    %159 = arith.mulf %150, %124 : vector<2x16xf32>
    %160 = arith.addf %158, %159 : vector<2x16xf32>
    %cst_55 = arith.constant dense<0.000000e+00> : vector<2x24xf32>
    %161 = tpu.matmul %160, %18, %cst_55 {dimension_numbers = #tpu.dot_dimension_numbers<[1], [0], [0], [1], [0, 0, 1, 1], [], []>} : vector<2x16xf32>, vector<16x24xf32>, vector<2x24xf32> -> vector<2x24xf32>
    %162 = vector.broadcast %19 : vector<1x24xf32> to vector<2x24xf32>
    %163 = arith.addf %161, %162 : vector<2x24xf32>
    %cst_56 = arith.constant dense<0.000000e+00> : vector<2x48xf32>
    %164 = tpu.matmul %160, %16, %cst_56 {dimension_numbers = #tpu.dot_dimension_numbers<[1], [0], [0], [1], [0, 0, 1, 1], [], []>} : vector<2x16xf32>, vector<16x48xf32>, vector<2x48xf32> -> vector<2x48xf32>
    %165 = vector.broadcast %17 : vector<1x48xf32> to vector<2x48xf32>
    %166 = arith.addf %164, %165 : vector<2x48xf32>
    %167 = vector.extract_strided_slice %15 {offsets = [0, 0], sizes = [2, 16], strides = [1, 1]} : vector<2x48xf32> to vector<2x16xf32>
    %168 = vector.extract_strided_slice %166 {offsets = [0, 0], sizes = [2, 16], strides = [1, 1]} : vector<2x48xf32> to vector<2x16xf32>
    %169 = arith.addf %167, %168 : vector<2x16xf32>
    %cst_57 = arith.constant 0.000000e+00 : f32
    %170 = vector.broadcast %cst_57 : f32 to vector<2x16xf32>
    %171 = arith.subf %170, %169 : vector<2x16xf32>
    %172 = math.exp %171 : vector<2x16xf32>
    %cst_58 = arith.constant 1.000000e+00 : f32
    %173 = vector.broadcast %cst_58 : f32 to vector<2x16xf32>
    %174 = arith.addf %173, %172 : vector<2x16xf32>
    %cst_59 = arith.constant 1.000000e+00 : f32
    %175 = vector.broadcast %cst_59 : f32 to vector<2x16xf32>
    %176 = arith.divf %175, %174 : vector<2x16xf32>
    %177 = vector.extract_strided_slice %15 {offsets = [0, 16], sizes = [2, 16], strides = [1, 1]} : vector<2x48xf32> to vector<2x16xf32>
    %178 = vector.extract_strided_slice %166 {offsets = [0, 16], sizes = [2, 16], strides = [1, 1]} : vector<2x48xf32> to vector<2x16xf32>
    %179 = arith.addf %177, %178 : vector<2x16xf32>
    %cst_60 = arith.constant 0.000000e+00 : f32
    %180 = vector.broadcast %cst_60 : f32 to vector<2x16xf32>
    %181 = arith.subf %180, %179 : vector<2x16xf32>
    %182 = math.exp %181 : vector<2x16xf32>
    %cst_61 = arith.constant 1.000000e+00 : f32
    %183 = vector.broadcast %cst_61 : f32 to vector<2x16xf32>
    %184 = arith.addf %183, %182 : vector<2x16xf32>
    %cst_62 = arith.constant 1.000000e+00 : f32
    %185 = vector.broadcast %cst_62 : f32 to vector<2x16xf32>
    %186 = arith.divf %185, %184 : vector<2x16xf32>
    %187 = vector.extract_strided_slice %15 {offsets = [0, 32], sizes = [2, 16], strides = [1, 1]} : vector<2x48xf32> to vector<2x16xf32>
    %188 = vector.extract_strided_slice %166 {offsets = [0, 32], sizes = [2, 16], strides = [1, 1]} : vector<2x48xf32> to vector<2x16xf32>
    %189 = arith.mulf %176, %188 : vector<2x16xf32>
    %190 = arith.addf %187, %189 : vector<2x16xf32>
    %191 = math.tanh %190 : vector<2x16xf32>
    %cst_63 = arith.constant 1.000000e+00 : f32
    %192 = vector.broadcast %cst_63 : f32 to vector<2x16xf32>
    %193 = arith.subf %192, %186 : vector<2x16xf32>
    %194 = arith.mulf %193, %191 : vector<2x16xf32>
    %195 = arith.mulf %186, %160 : vector<2x16xf32>
    %196 = arith.addf %194, %195 : vector<2x16xf32>
    %cst_64 = arith.constant dense<0.000000e+00> : vector<2x24xf32>
    %197 = tpu.matmul %196, %18, %cst_64 {dimension_numbers = #tpu.dot_dimension_numbers<[1], [0], [0], [1], [0, 0, 1, 1], [], []>} : vector<2x16xf32>, vector<16x24xf32>, vector<2x24xf32> -> vector<2x24xf32>
    %198 = vector.broadcast %19 : vector<1x24xf32> to vector<2x24xf32>
    %199 = arith.addf %197, %198 : vector<2x24xf32>
    %cst_65 = arith.constant dense<0.000000e+00> : vector<2x48xf32>
    %200 = tpu.matmul %196, %16, %cst_65 {dimension_numbers = #tpu.dot_dimension_numbers<[1], [0], [0], [1], [0, 0, 1, 1], [], []>} : vector<2x16xf32>, vector<16x48xf32>, vector<2x48xf32> -> vector<2x48xf32>
    %201 = vector.broadcast %17 : vector<1x48xf32> to vector<2x48xf32>
    %202 = arith.addf %200, %201 : vector<2x48xf32>
    %203 = vector.extract_strided_slice %15 {offsets = [0, 0], sizes = [2, 16], strides = [1, 1]} : vector<2x48xf32> to vector<2x16xf32>
    %204 = vector.extract_strided_slice %202 {offsets = [0, 0], sizes = [2, 16], strides = [1, 1]} : vector<2x48xf32> to vector<2x16xf32>
    %205 = arith.addf %203, %204 : vector<2x16xf32>
    %cst_66 = arith.constant 0.000000e+00 : f32
    %206 = vector.broadcast %cst_66 : f32 to vector<2x16xf32>
    %207 = arith.subf %206, %205 : vector<2x16xf32>
    %208 = math.exp %207 : vector<2x16xf32>
    %cst_67 = arith.constant 1.000000e+00 : f32
    %209 = vector.broadcast %cst_67 : f32 to vector<2x16xf32>
    %210 = arith.addf %209, %208 : vector<2x16xf32>
    %cst_68 = arith.constant 1.000000e+00 : f32
    %211 = vector.broadcast %cst_68 : f32 to vector<2x16xf32>
    %212 = arith.divf %211, %210 : vector<2x16xf32>
    %213 = vector.extract_strided_slice %15 {offsets = [0, 16], sizes = [2, 16], strides = [1, 1]} : vector<2x48xf32> to vector<2x16xf32>
    %214 = vector.extract_strided_slice %202 {offsets = [0, 16], sizes = [2, 16], strides = [1, 1]} : vector<2x48xf32> to vector<2x16xf32>
    %215 = arith.addf %213, %214 : vector<2x16xf32>
    %cst_69 = arith.constant 0.000000e+00 : f32
    %216 = vector.broadcast %cst_69 : f32 to vector<2x16xf32>
    %217 = arith.subf %216, %215 : vector<2x16xf32>
    %218 = math.exp %217 : vector<2x16xf32>
    %cst_70 = arith.constant 1.000000e+00 : f32
    %219 = vector.broadcast %cst_70 : f32 to vector<2x16xf32>
    %220 = arith.addf %219, %218 : vector<2x16xf32>
    %cst_71 = arith.constant 1.000000e+00 : f32
    %221 = vector.broadcast %cst_71 : f32 to vector<2x16xf32>
    %222 = arith.divf %221, %220 : vector<2x16xf32>
    %223 = vector.extract_strided_slice %15 {offsets = [0, 32], sizes = [2, 16], strides = [1, 1]} : vector<2x48xf32> to vector<2x16xf32>
    %224 = vector.extract_strided_slice %202 {offsets = [0, 32], sizes = [2, 16], strides = [1, 1]} : vector<2x48xf32> to vector<2x16xf32>
    %225 = arith.mulf %212, %224 : vector<2x16xf32>
    %226 = arith.addf %223, %225 : vector<2x16xf32>
    %227 = math.tanh %226 : vector<2x16xf32>
    %cst_72 = arith.constant 1.000000e+00 : f32
    %228 = vector.broadcast %cst_72 : f32 to vector<2x16xf32>
    %229 = arith.subf %228, %222 : vector<2x16xf32>
    %230 = arith.mulf %229, %227 : vector<2x16xf32>
    %231 = arith.mulf %222, %196 : vector<2x16xf32>
    %232 = arith.addf %230, %231 : vector<2x16xf32>
    %cst_73 = arith.constant dense<0.000000e+00> : vector<2x24xf32>
    %233 = tpu.matmul %232, %18, %cst_73 {dimension_numbers = #tpu.dot_dimension_numbers<[1], [0], [0], [1], [0, 0, 1, 1], [], []>} : vector<2x16xf32>, vector<16x24xf32>, vector<2x24xf32> -> vector<2x24xf32>
    %234 = vector.broadcast %19 : vector<1x24xf32> to vector<2x24xf32>
    %235 = arith.addf %233, %234 : vector<2x24xf32>
    %cst_74 = arith.constant dense<0.000000e+00> : vector<2x48xf32>
    %236 = tpu.matmul %232, %16, %cst_74 {dimension_numbers = #tpu.dot_dimension_numbers<[1], [0], [0], [1], [0, 0, 1, 1], [], []>} : vector<2x16xf32>, vector<16x48xf32>, vector<2x48xf32> -> vector<2x48xf32>
    %237 = vector.broadcast %17 : vector<1x48xf32> to vector<2x48xf32>
    %238 = arith.addf %236, %237 : vector<2x48xf32>
    %239 = vector.extract_strided_slice %15 {offsets = [0, 0], sizes = [2, 16], strides = [1, 1]} : vector<2x48xf32> to vector<2x16xf32>
    %240 = vector.extract_strided_slice %238 {offsets = [0, 0], sizes = [2, 16], strides = [1, 1]} : vector<2x48xf32> to vector<2x16xf32>
    %241 = arith.addf %239, %240 : vector<2x16xf32>
    %cst_75 = arith.constant 0.000000e+00 : f32
    %242 = vector.broadcast %cst_75 : f32 to vector<2x16xf32>
    %243 = arith.subf %242, %241 : vector<2x16xf32>
    %244 = math.exp %243 : vector<2x16xf32>
    %cst_76 = arith.constant 1.000000e+00 : f32
    %245 = vector.broadcast %cst_76 : f32 to vector<2x16xf32>
    %246 = arith.addf %245, %244 : vector<2x16xf32>
    %cst_77 = arith.constant 1.000000e+00 : f32
    %247 = vector.broadcast %cst_77 : f32 to vector<2x16xf32>
    %248 = arith.divf %247, %246 : vector<2x16xf32>
    %249 = vector.extract_strided_slice %15 {offsets = [0, 16], sizes = [2, 16], strides = [1, 1]} : vector<2x48xf32> to vector<2x16xf32>
    %250 = vector.extract_strided_slice %238 {offsets = [0, 16], sizes = [2, 16], strides = [1, 1]} : vector<2x48xf32> to vector<2x16xf32>
    %251 = arith.addf %249, %250 : vector<2x16xf32>
    %cst_78 = arith.constant 0.000000e+00 : f32
    %252 = vector.broadcast %cst_78 : f32 to vector<2x16xf32>
    %253 = arith.subf %252, %251 : vector<2x16xf32>
    %254 = math.exp %253 : vector<2x16xf32>
    %cst_79 = arith.constant 1.000000e+00 : f32
    %255 = vector.broadcast %cst_79 : f32 to vector<2x16xf32>
    %256 = arith.addf %255, %254 : vector<2x16xf32>
    %cst_80 = arith.constant 1.000000e+00 : f32
    %257 = vector.broadcast %cst_80 : f32 to vector<2x16xf32>
    %258 = arith.divf %257, %256 : vector<2x16xf32>
    %259 = vector.extract_strided_slice %15 {offsets = [0, 32], sizes = [2, 16], strides = [1, 1]} : vector<2x48xf32> to vector<2x16xf32>
    %260 = vector.extract_strided_slice %238 {offsets = [0, 32], sizes = [2, 16], strides = [1, 1]} : vector<2x48xf32> to vector<2x16xf32>
    %261 = arith.mulf %248, %260 : vector<2x16xf32>
    %262 = arith.addf %259, %261 : vector<2x16xf32>
    %263 = math.tanh %262 : vector<2x16xf32>
    %cst_81 = arith.constant 1.000000e+00 : f32
    %264 = vector.broadcast %cst_81 : f32 to vector<2x16xf32>
    %265 = arith.subf %264, %258 : vector<2x16xf32>
    %266 = arith.mulf %265, %263 : vector<2x16xf32>
    %267 = arith.mulf %258, %232 : vector<2x16xf32>
    %268 = arith.addf %266, %267 : vector<2x16xf32>
    %cst_82 = arith.constant dense<0.000000e+00> : vector<2x24xf32>
    %269 = tpu.matmul %268, %18, %cst_82 {dimension_numbers = #tpu.dot_dimension_numbers<[1], [0], [0], [1], [0, 0, 1, 1], [], []>} : vector<2x16xf32>, vector<16x24xf32>, vector<2x24xf32> -> vector<2x24xf32>
    %270 = vector.broadcast %19 : vector<1x24xf32> to vector<2x24xf32>
    %271 = arith.addf %269, %270 : vector<2x24xf32>
    %cst_83 = arith.constant dense<0.000000e+00> : vector<2x48xf32>
    %272 = tpu.matmul %268, %16, %cst_83 {dimension_numbers = #tpu.dot_dimension_numbers<[1], [0], [0], [1], [0, 0, 1, 1], [], []>} : vector<2x16xf32>, vector<16x48xf32>, vector<2x48xf32> -> vector<2x48xf32>
    %273 = vector.broadcast %17 : vector<1x48xf32> to vector<2x48xf32>
    %274 = arith.addf %272, %273 : vector<2x48xf32>
    %275 = vector.extract_strided_slice %15 {offsets = [0, 0], sizes = [2, 16], strides = [1, 1]} : vector<2x48xf32> to vector<2x16xf32>
    %276 = vector.extract_strided_slice %274 {offsets = [0, 0], sizes = [2, 16], strides = [1, 1]} : vector<2x48xf32> to vector<2x16xf32>
    %277 = arith.addf %275, %276 : vector<2x16xf32>
    %cst_84 = arith.constant 0.000000e+00 : f32
    %278 = vector.broadcast %cst_84 : f32 to vector<2x16xf32>
    %279 = arith.subf %278, %277 : vector<2x16xf32>
    %280 = math.exp %279 : vector<2x16xf32>
    %cst_85 = arith.constant 1.000000e+00 : f32
    %281 = vector.broadcast %cst_85 : f32 to vector<2x16xf32>
    %282 = arith.addf %281, %280 : vector<2x16xf32>
    %cst_86 = arith.constant 1.000000e+00 : f32
    %283 = vector.broadcast %cst_86 : f32 to vector<2x16xf32>
    %284 = arith.divf %283, %282 : vector<2x16xf32>
    %285 = vector.extract_strided_slice %15 {offsets = [0, 16], sizes = [2, 16], strides = [1, 1]} : vector<2x48xf32> to vector<2x16xf32>
    %286 = vector.extract_strided_slice %274 {offsets = [0, 16], sizes = [2, 16], strides = [1, 1]} : vector<2x48xf32> to vector<2x16xf32>
    %287 = arith.addf %285, %286 : vector<2x16xf32>
    %cst_87 = arith.constant 0.000000e+00 : f32
    %288 = vector.broadcast %cst_87 : f32 to vector<2x16xf32>
    %289 = arith.subf %288, %287 : vector<2x16xf32>
    %290 = math.exp %289 : vector<2x16xf32>
    %cst_88 = arith.constant 1.000000e+00 : f32
    %291 = vector.broadcast %cst_88 : f32 to vector<2x16xf32>
    %292 = arith.addf %291, %290 : vector<2x16xf32>
    %cst_89 = arith.constant 1.000000e+00 : f32
    %293 = vector.broadcast %cst_89 : f32 to vector<2x16xf32>
    %294 = arith.divf %293, %292 : vector<2x16xf32>
    %295 = vector.extract_strided_slice %15 {offsets = [0, 32], sizes = [2, 16], strides = [1, 1]} : vector<2x48xf32> to vector<2x16xf32>
    %296 = vector.extract_strided_slice %274 {offsets = [0, 32], sizes = [2, 16], strides = [1, 1]} : vector<2x48xf32> to vector<2x16xf32>
    %297 = arith.mulf %284, %296 : vector<2x16xf32>
    %298 = arith.addf %295, %297 : vector<2x16xf32>
    %299 = math.tanh %298 : vector<2x16xf32>
    %cst_90 = arith.constant 1.000000e+00 : f32
    %300 = vector.broadcast %cst_90 : f32 to vector<2x16xf32>
    %301 = arith.subf %300, %294 : vector<2x16xf32>
    %302 = arith.mulf %301, %299 : vector<2x16xf32>
    %303 = arith.mulf %294, %268 : vector<2x16xf32>
    %304 = arith.addf %302, %303 : vector<2x16xf32>
    %cst_91 = arith.constant dense<0.000000e+00> : vector<2x24xf32>
    %305 = tpu.matmul %304, %18, %cst_91 {dimension_numbers = #tpu.dot_dimension_numbers<[1], [0], [0], [1], [0, 0, 1, 1], [], []>} : vector<2x16xf32>, vector<16x24xf32>, vector<2x24xf32> -> vector<2x24xf32>
    %306 = vector.broadcast %19 : vector<1x24xf32> to vector<2x24xf32>
    %307 = arith.addf %305, %306 : vector<2x24xf32>
    %308 = tpu.concatenate %52, %88, %124, %160, %196, %232, %268, %304 in 1 : vector<2x16xf32>, vector<2x16xf32>, vector<2x16xf32>, vector<2x16xf32>, vector<2x16xf32>, vector<2x16xf32>, vector<2x16xf32>, vector<2x16xf32> -> vector<2x128xf32>
    %c0_92 = arith.constant 0 : index
    %c0_93 = arith.constant 0 : index
    %309 = vector.load %arg13[%c0_92, %c0_93] : memref<128x64xf32, #tpu.memory_space<vmem>>, vector<128x64xf32>
    %cst_94 = arith.constant dense<0.000000e+00> : vector<2x64xf32>
    %310 = tpu.matmul %308, %309, %cst_94 {dimension_numbers = #tpu.dot_dimension_numbers<[1], [0], [0], [1], [0, 0, 1, 1], [], []>} : vector<2x128xf32>, vector<128x64xf32>, vector<2x64xf32> -> vector<2x64xf32>
    %c0_95 = arith.constant 0 : index
    %c0_96 = arith.constant 0 : index
    %311 = vector.load %arg14[%c0_95, %c0_96] : memref<1x64xf32, #tpu.memory_space<vmem>>, vector<1x64xf32>
    %312 = vector.broadcast %311 : vector<1x64xf32> to vector<2x64xf32>
    %313 = arith.addf %310, %312 : vector<2x64xf32>
    %c0_97 = arith.constant 0 : index
    %c0_98 = arith.constant 0 : index
    %314 = vector.load %arg3[%c0_97, %c0_98] : memref<16x8xf32, #tpu.memory_space<vmem>>, vector<16x8xf32>
    %cst_99 = arith.constant dense<0.000000e+00> : vector<2x8xf32>
    %315 = tpu.matmul %304, %314, %cst_99 {dimension_numbers = #tpu.dot_dimension_numbers<[1], [0], [0], [1], [0, 0, 1, 1], [], []>} : vector<2x16xf32>, vector<16x8xf32>, vector<2x8xf32> -> vector<2x8xf32>
    %c0_100 = arith.constant 0 : index
    %c0_101 = arith.constant 0 : index
    %316 = vector.load %arg4[%c0_100, %c0_101] : memref<1x8xf32, #tpu.memory_space<vmem>>, vector<1x8xf32>
    %317 = vector.broadcast %316 : vector<1x8xf32> to vector<2x8xf32>
    %318 = arith.addf %315, %317 : vector<2x8xf32>
    %cst_102 = arith.constant 0.000000e+00 : f32
    %319 = vector.broadcast %cst_102 : f32 to vector<2x8xf32>
    %320 = arith.cmpf ogt, %318, %319 : vector<2x8xf32>
    %cst_103 = arith.constant 2.000000e-01 : f32
    %321 = vector.broadcast %cst_103 : f32 to vector<2x8xf32>
    %322 = arith.mulf %321, %318 : vector<2x8xf32>
    %323 = arith.select %320, %318, %322 : vector<2x8xi1>, vector<2x8xf32>
    %c0_104 = arith.constant 0 : index
    %c0_105 = arith.constant 0 : index
    %324 = vector.load %arg10[%c0_104, %c0_105] : memref<8x24xf32, #tpu.memory_space<vmem>>, vector<8x24xf32>
    %c0_106 = arith.constant 0 : index
    %c0_107 = arith.constant 0 : index
    %325 = vector.load %arg12[%c0_106, %c0_107] : memref<1x24xf32, #tpu.memory_space<vmem>>, vector<1x24xf32>
    %cst_108 = arith.constant dense<0.000000e+00> : vector<2x24xf32>
    %326 = tpu.matmul %323, %324, %cst_108 {dimension_numbers = #tpu.dot_dimension_numbers<[1], [0], [0], [1], [0, 0, 1, 1], [], []>} : vector<2x8xf32>, vector<8x24xf32>, vector<2x24xf32> -> vector<2x24xf32>
    %327 = vector.broadcast %325 : vector<1x24xf32> to vector<2x24xf32>
    %328 = arith.addf %326, %327 : vector<2x24xf32>
    %329 = vector.extract_strided_slice %55 {offsets = [0, 0], sizes = [2, 8], strides = [1, 1]} : vector<2x24xf32> to vector<2x8xf32>
    %330 = vector.extract_strided_slice %328 {offsets = [0, 0], sizes = [2, 8], strides = [1, 1]} : vector<2x24xf32> to vector<2x8xf32>
    %331 = arith.addf %329, %330 : vector<2x8xf32>
    %cst_109 = arith.constant 0.000000e+00 : f32
    %332 = vector.broadcast %cst_109 : f32 to vector<2x8xf32>
    %333 = arith.subf %332, %331 : vector<2x8xf32>
    %334 = math.exp %333 : vector<2x8xf32>
    %cst_110 = arith.constant 1.000000e+00 : f32
    %335 = vector.broadcast %cst_110 : f32 to vector<2x8xf32>
    %336 = arith.addf %335, %334 : vector<2x8xf32>
    %cst_111 = arith.constant 1.000000e+00 : f32
    %337 = vector.broadcast %cst_111 : f32 to vector<2x8xf32>
    %338 = arith.divf %337, %336 : vector<2x8xf32>
    %339 = vector.extract_strided_slice %55 {offsets = [0, 8], sizes = [2, 8], strides = [1, 1]} : vector<2x24xf32> to vector<2x8xf32>
    %340 = vector.extract_strided_slice %328 {offsets = [0, 8], sizes = [2, 8], strides = [1, 1]} : vector<2x24xf32> to vector<2x8xf32>
    %341 = arith.addf %339, %340 : vector<2x8xf32>
    %cst_112 = arith.constant 0.000000e+00 : f32
    %342 = vector.broadcast %cst_112 : f32 to vector<2x8xf32>
    %343 = arith.subf %342, %341 : vector<2x8xf32>
    %344 = math.exp %343 : vector<2x8xf32>
    %cst_113 = arith.constant 1.000000e+00 : f32
    %345 = vector.broadcast %cst_113 : f32 to vector<2x8xf32>
    %346 = arith.addf %345, %344 : vector<2x8xf32>
    %cst_114 = arith.constant 1.000000e+00 : f32
    %347 = vector.broadcast %cst_114 : f32 to vector<2x8xf32>
    %348 = arith.divf %347, %346 : vector<2x8xf32>
    %349 = vector.extract_strided_slice %55 {offsets = [0, 16], sizes = [2, 8], strides = [1, 1]} : vector<2x24xf32> to vector<2x8xf32>
    %350 = vector.extract_strided_slice %328 {offsets = [0, 16], sizes = [2, 8], strides = [1, 1]} : vector<2x24xf32> to vector<2x8xf32>
    %351 = arith.mulf %338, %350 : vector<2x8xf32>
    %352 = arith.addf %349, %351 : vector<2x8xf32>
    %353 = math.tanh %352 : vector<2x8xf32>
    %cst_115 = arith.constant 1.000000e+00 : f32
    %354 = vector.broadcast %cst_115 : f32 to vector<2x8xf32>
    %355 = arith.subf %354, %348 : vector<2x8xf32>
    %356 = arith.mulf %355, %353 : vector<2x8xf32>
    %357 = arith.mulf %348, %323 : vector<2x8xf32>
    %358 = arith.addf %356, %357 : vector<2x8xf32>
    %359 = vector.extract_strided_slice %313 {offsets = [0, 0], sizes = [2, 8], strides = [1, 1]} : vector<2x64xf32> to vector<2x8xf32>
    %360 = arith.addf %358, %359 : vector<2x8xf32>
    %c0_116 = arith.constant 0 : index
    %c0_117 = arith.constant 0 : index
    %c0_118 = arith.constant 0 : index
    %361 = vector.load %arg15[%c0_116, %c0_117, %c0_118] : memref<8x2x8xf32, #tpu.memory_space<vmem>>, vector<1x2x8xf32>
    %362 = vector.shape_cast %361 : vector<1x2x8xf32> to vector<2x8xf32>
    %363 = vector.shape_cast %360 : vector<2x8xf32> to vector<1x2x8xf32>
    tpu.vector_store %arg15[%c0_116, %c0_117, %c0_118], %363 {strides = array<i32>} : memref<8x2x8xf32, #tpu.memory_space<vmem>>, vector<1x2x8xf32>,
    %cst_119 = arith.constant dense<0.000000e+00> : vector<2x24xf32>
    %364 = tpu.matmul %358, %324, %cst_119 {dimension_numbers = #tpu.dot_dimension_numbers<[1], [0], [0], [1], [0, 0, 1, 1], [], []>} : vector<2x8xf32>, vector<8x24xf32>, vector<2x24xf32> -> vector<2x24xf32>
    %365 = vector.broadcast %325 : vector<1x24xf32> to vector<2x24xf32>
    %366 = arith.addf %364, %365 : vector<2x24xf32>
    %367 = vector.extract_strided_slice %91 {offsets = [0, 0], sizes = [2, 8], strides = [1, 1]} : vector<2x24xf32> to vector<2x8xf32>
    %368 = vector.extract_strided_slice %366 {offsets = [0, 0], sizes = [2, 8], strides = [1, 1]} : vector<2x24xf32> to vector<2x8xf32>
    %369 = arith.addf %367, %368 : vector<2x8xf32>
    %cst_120 = arith.constant 0.000000e+00 : f32
    %370 = vector.broadcast %cst_120 : f32 to vector<2x8xf32>
    %371 = arith.subf %370, %369 : vector<2x8xf32>
    %372 = math.exp %371 : vector<2x8xf32>
    %cst_121 = arith.constant 1.000000e+00 : f32
    %373 = vector.broadcast %cst_121 : f32 to vector<2x8xf32>
    %374 = arith.addf %373, %372 : vector<2x8xf32>
    %cst_122 = arith.constant 1.000000e+00 : f32
    %375 = vector.broadcast %cst_122 : f32 to vector<2x8xf32>
    %376 = arith.divf %375, %374 : vector<2x8xf32>
    %377 = vector.extract_strided_slice %91 {offsets = [0, 8], sizes = [2, 8], strides = [1, 1]} : vector<2x24xf32> to vector<2x8xf32>
    %378 = vector.extract_strided_slice %366 {offsets = [0, 8], sizes = [2, 8], strides = [1, 1]} : vector<2x24xf32> to vector<2x8xf32>
    %379 = arith.addf %377, %378 : vector<2x8xf32>
    %cst_123 = arith.constant 0.000000e+00 : f32
    %380 = vector.broadcast %cst_123 : f32 to vector<2x8xf32>
    %381 = arith.subf %380, %379 : vector<2x8xf32>
    %382 = math.exp %381 : vector<2x8xf32>
    %cst_124 = arith.constant 1.000000e+00 : f32
    %383 = vector.broadcast %cst_124 : f32 to vector<2x8xf32>
    %384 = arith.addf %383, %382 : vector<2x8xf32>
    %cst_125 = arith.constant 1.000000e+00 : f32
    %385 = vector.broadcast %cst_125 : f32 to vector<2x8xf32>
    %386 = arith.divf %385, %384 : vector<2x8xf32>
    %387 = vector.extract_strided_slice %91 {offsets = [0, 16], sizes = [2, 8], strides = [1, 1]} : vector<2x24xf32> to vector<2x8xf32>
    %388 = vector.extract_strided_slice %366 {offsets = [0, 16], sizes = [2, 8], strides = [1, 1]} : vector<2x24xf32> to vector<2x8xf32>
    %389 = arith.mulf %376, %388 : vector<2x8xf32>
    %390 = arith.addf %387, %389 : vector<2x8xf32>
    %391 = math.tanh %390 : vector<2x8xf32>
    %cst_126 = arith.constant 1.000000e+00 : f32
    %392 = vector.broadcast %cst_126 : f32 to vector<2x8xf32>
    %393 = arith.subf %392, %386 : vector<2x8xf32>
    %394 = arith.mulf %393, %391 : vector<2x8xf32>
    %395 = arith.mulf %386, %358 : vector<2x8xf32>
    %396 = arith.addf %394, %395 : vector<2x8xf32>
    %397 = vector.extract_strided_slice %313 {offsets = [0, 8], sizes = [2, 8], strides = [1, 1]} : vector<2x64xf32> to vector<2x8xf32>
    %398 = arith.addf %396, %397 : vector<2x8xf32>
    %c1 = arith.constant 1 : index
    %c0_127 = arith.constant 0 : index
    %c0_128 = arith.constant 0 : index
    %399 = vector.load %arg15[%c1, %c0_127, %c0_128] : memref<8x2x8xf32, #tpu.memory_space<vmem>>, vector<1x2x8xf32>
    %400 = vector.shape_cast %399 : vector<1x2x8xf32> to vector<2x8xf32>
    %401 = vector.shape_cast %398 : vector<2x8xf32> to vector<1x2x8xf32>
    tpu.vector_store %arg15[%c1, %c0_127, %c0_128], %401 {strides = array<i32>} : memref<8x2x8xf32, #tpu.memory_space<vmem>>, vector<1x2x8xf32>,
    %cst_129 = arith.constant dense<0.000000e+00> : vector<2x24xf32>
    %402 = tpu.matmul %396, %324, %cst_129 {dimension_numbers = #tpu.dot_dimension_numbers<[1], [0], [0], [1], [0, 0, 1, 1], [], []>} : vector<2x8xf32>, vector<8x24xf32>, vector<2x24xf32> -> vector<2x24xf32>
    %403 = vector.broadcast %325 : vector<1x24xf32> to vector<2x24xf32>
    %404 = arith.addf %402, %403 : vector<2x24xf32>
    %405 = vector.extract_strided_slice %127 {offsets = [0, 0], sizes = [2, 8], strides = [1, 1]} : vector<2x24xf32> to vector<2x8xf32>
    %406 = vector.extract_strided_slice %404 {offsets = [0, 0], sizes = [2, 8], strides = [1, 1]} : vector<2x24xf32> to vector<2x8xf32>
    %407 = arith.addf %405, %406 : vector<2x8xf32>
    %cst_130 = arith.constant 0.000000e+00 : f32
    %408 = vector.broadcast %cst_130 : f32 to vector<2x8xf32>
    %409 = arith.subf %408, %407 : vector<2x8xf32>
    %410 = math.exp %409 : vector<2x8xf32>
    %cst_131 = arith.constant 1.000000e+00 : f32
    %411 = vector.broadcast %cst_131 : f32 to vector<2x8xf32>
    %412 = arith.addf %411, %410 : vector<2x8xf32>
    %cst_132 = arith.constant 1.000000e+00 : f32
    %413 = vector.broadcast %cst_132 : f32 to vector<2x8xf32>
    %414 = arith.divf %413, %412 : vector<2x8xf32>
    %415 = vector.extract_strided_slice %127 {offsets = [0, 8], sizes = [2, 8], strides = [1, 1]} : vector<2x24xf32> to vector<2x8xf32>
    %416 = vector.extract_strided_slice %404 {offsets = [0, 8], sizes = [2, 8], strides = [1, 1]} : vector<2x24xf32> to vector<2x8xf32>
    %417 = arith.addf %415, %416 : vector<2x8xf32>
    %cst_133 = arith.constant 0.000000e+00 : f32
    %418 = vector.broadcast %cst_133 : f32 to vector<2x8xf32>
    %419 = arith.subf %418, %417 : vector<2x8xf32>
    %420 = math.exp %419 : vector<2x8xf32>
    %cst_134 = arith.constant 1.000000e+00 : f32
    %421 = vector.broadcast %cst_134 : f32 to vector<2x8xf32>
    %422 = arith.addf %421, %420 : vector<2x8xf32>
    %cst_135 = arith.constant 1.000000e+00 : f32
    %423 = vector.broadcast %cst_135 : f32 to vector<2x8xf32>
    %424 = arith.divf %423, %422 : vector<2x8xf32>
    %425 = vector.extract_strided_slice %127 {offsets = [0, 16], sizes = [2, 8], strides = [1, 1]} : vector<2x24xf32> to vector<2x8xf32>
    %426 = vector.extract_strided_slice %404 {offsets = [0, 16], sizes = [2, 8], strides = [1, 1]} : vector<2x24xf32> to vector<2x8xf32>
    %427 = arith.mulf %414, %426 : vector<2x8xf32>
    %428 = arith.addf %425, %427 : vector<2x8xf32>
    %429 = math.tanh %428 : vector<2x8xf32>
    %cst_136 = arith.constant 1.000000e+00 : f32
    %430 = vector.broadcast %cst_136 : f32 to vector<2x8xf32>
    %431 = arith.subf %430, %424 : vector<2x8xf32>
    %432 = arith.mulf %431, %429 : vector<2x8xf32>
    %433 = arith.mulf %424, %396 : vector<2x8xf32>
    %434 = arith.addf %432, %433 : vector<2x8xf32>
    %435 = vector.extract_strided_slice %313 {offsets = [0, 16], sizes = [2, 8], strides = [1, 1]} : vector<2x64xf32> to vector<2x8xf32>
    %436 = arith.addf %434, %435 : vector<2x8xf32>
    %c2 = arith.constant 2 : index
    %c0_137 = arith.constant 0 : index
    %c0_138 = arith.constant 0 : index
    %437 = vector.load %arg15[%c2, %c0_137, %c0_138] : memref<8x2x8xf32, #tpu.memory_space<vmem>>, vector<1x2x8xf32>
    %438 = vector.shape_cast %437 : vector<1x2x8xf32> to vector<2x8xf32>
    %439 = vector.shape_cast %436 : vector<2x8xf32> to vector<1x2x8xf32>
    tpu.vector_store %arg15[%c2, %c0_137, %c0_138], %439 {strides = array<i32>} : memref<8x2x8xf32, #tpu.memory_space<vmem>>, vector<1x2x8xf32>,
    %cst_139 = arith.constant dense<0.000000e+00> : vector<2x24xf32>
    %440 = tpu.matmul %434, %324, %cst_139 {dimension_numbers = #tpu.dot_dimension_numbers<[1], [0], [0], [1], [0, 0, 1, 1], [], []>} : vector<2x8xf32>, vector<8x24xf32>, vector<2x24xf32> -> vector<2x24xf32>
    %441 = vector.broadcast %325 : vector<1x24xf32> to vector<2x24xf32>
    %442 = arith.addf %440, %441 : vector<2x24xf32>
    %443 = vector.extract_strided_slice %163 {offsets = [0, 0], sizes = [2, 8], strides = [1, 1]} : vector<2x24xf32> to vector<2x8xf32>
    %444 = vector.extract_strided_slice %442 {offsets = [0, 0], sizes = [2, 8], strides = [1, 1]} : vector<2x24xf32> to vector<2x8xf32>
    %445 = arith.addf %443, %444 : vector<2x8xf32>
    %cst_140 = arith.constant 0.000000e+00 : f32
    %446 = vector.broadcast %cst_140 : f32 to vector<2x8xf32>
    %447 = arith.subf %446, %445 : vector<2x8xf32>
    %448 = math.exp %447 : vector<2x8xf32>
    %cst_141 = arith.constant 1.000000e+00 : f32
    %449 = vector.broadcast %cst_141 : f32 to vector<2x8xf32>
    %450 = arith.addf %449, %448 : vector<2x8xf32>
    %cst_142 = arith.constant 1.000000e+00 : f32
    %451 = vector.broadcast %cst_142 : f32 to vector<2x8xf32>
    %452 = arith.divf %451, %450 : vector<2x8xf32>
    %453 = vector.extract_strided_slice %163 {offsets = [0, 8], sizes = [2, 8], strides = [1, 1]} : vector<2x24xf32> to vector<2x8xf32>
    %454 = vector.extract_strided_slice %442 {offsets = [0, 8], sizes = [2, 8], strides = [1, 1]} : vector<2x24xf32> to vector<2x8xf32>
    %455 = arith.addf %453, %454 : vector<2x8xf32>
    %cst_143 = arith.constant 0.000000e+00 : f32
    %456 = vector.broadcast %cst_143 : f32 to vector<2x8xf32>
    %457 = arith.subf %456, %455 : vector<2x8xf32>
    %458 = math.exp %457 : vector<2x8xf32>
    %cst_144 = arith.constant 1.000000e+00 : f32
    %459 = vector.broadcast %cst_144 : f32 to vector<2x8xf32>
    %460 = arith.addf %459, %458 : vector<2x8xf32>
    %cst_145 = arith.constant 1.000000e+00 : f32
    %461 = vector.broadcast %cst_145 : f32 to vector<2x8xf32>
    %462 = arith.divf %461, %460 : vector<2x8xf32>
    %463 = vector.extract_strided_slice %163 {offsets = [0, 16], sizes = [2, 8], strides = [1, 1]} : vector<2x24xf32> to vector<2x8xf32>
    %464 = vector.extract_strided_slice %442 {offsets = [0, 16], sizes = [2, 8], strides = [1, 1]} : vector<2x24xf32> to vector<2x8xf32>
    %465 = arith.mulf %452, %464 : vector<2x8xf32>
    %466 = arith.addf %463, %465 : vector<2x8xf32>
    %467 = math.tanh %466 : vector<2x8xf32>
    %cst_146 = arith.constant 1.000000e+00 : f32
    %468 = vector.broadcast %cst_146 : f32 to vector<2x8xf32>
    %469 = arith.subf %468, %462 : vector<2x8xf32>
    %470 = arith.mulf %469, %467 : vector<2x8xf32>
    %471 = arith.mulf %462, %434 : vector<2x8xf32>
    %472 = arith.addf %470, %471 : vector<2x8xf32>
    %473 = vector.extract_strided_slice %313 {offsets = [0, 24], sizes = [2, 8], strides = [1, 1]} : vector<2x64xf32> to vector<2x8xf32>
    %474 = arith.addf %472, %473 : vector<2x8xf32>
    %c3 = arith.constant 3 : index
    %c0_147 = arith.constant 0 : index
    %c0_148 = arith.constant 0 : index
    %475 = vector.load %arg15[%c3, %c0_147, %c0_148] : memref<8x2x8xf32, #tpu.memory_space<vmem>>, vector<1x2x8xf32>
    %476 = vector.shape_cast %475 : vector<1x2x8xf32> to vector<2x8xf32>
    %477 = vector.shape_cast %474 : vector<2x8xf32> to vector<1x2x8xf32>
    tpu.vector_store %arg15[%c3, %c0_147, %c0_148], %477 {strides = array<i32>} : memref<8x2x8xf32, #tpu.memory_space<vmem>>, vector<1x2x8xf32>,
    %cst_149 = arith.constant dense<0.000000e+00> : vector<2x24xf32>
    %478 = tpu.matmul %472, %324, %cst_149 {dimension_numbers = #tpu.dot_dimension_numbers<[1], [0], [0], [1], [0, 0, 1, 1], [], []>} : vector<2x8xf32>, vector<8x24xf32>, vector<2x24xf32> -> vector<2x24xf32>
    %479 = vector.broadcast %325 : vector<1x24xf32> to vector<2x24xf32>
    %480 = arith.addf %478, %479 : vector<2x24xf32>
    %481 = vector.extract_strided_slice %199 {offsets = [0, 0], sizes = [2, 8], strides = [1, 1]} : vector<2x24xf32> to vector<2x8xf32>
    %482 = vector.extract_strided_slice %480 {offsets = [0, 0], sizes = [2, 8], strides = [1, 1]} : vector<2x24xf32> to vector<2x8xf32>
    %483 = arith.addf %481, %482 : vector<2x8xf32>
    %cst_150 = arith.constant 0.000000e+00 : f32
    %484 = vector.broadcast %cst_150 : f32 to vector<2x8xf32>
    %485 = arith.subf %484, %483 : vector<2x8xf32>
    %486 = math.exp %485 : vector<2x8xf32>
    %cst_151 = arith.constant 1.000000e+00 : f32
    %487 = vector.broadcast %cst_151 : f32 to vector<2x8xf32>
    %488 = arith.addf %487, %486 : vector<2x8xf32>
    %cst_152 = arith.constant 1.000000e+00 : f32
    %489 = vector.broadcast %cst_152 : f32 to vector<2x8xf32>
    %490 = arith.divf %489, %488 : vector<2x8xf32>
    %491 = vector.extract_strided_slice %199 {offsets = [0, 8], sizes = [2, 8], strides = [1, 1]} : vector<2x24xf32> to vector<2x8xf32>
    %492 = vector.extract_strided_slice %480 {offsets = [0, 8], sizes = [2, 8], strides = [1, 1]} : vector<2x24xf32> to vector<2x8xf32>
    %493 = arith.addf %491, %492 : vector<2x8xf32>
    %cst_153 = arith.constant 0.000000e+00 : f32
    %494 = vector.broadcast %cst_153 : f32 to vector<2x8xf32>
    %495 = arith.subf %494, %493 : vector<2x8xf32>
    %496 = math.exp %495 : vector<2x8xf32>
    %cst_154 = arith.constant 1.000000e+00 : f32
    %497 = vector.broadcast %cst_154 : f32 to vector<2x8xf32>
    %498 = arith.addf %497, %496 : vector<2x8xf32>
    %cst_155 = arith.constant 1.000000e+00 : f32
    %499 = vector.broadcast %cst_155 : f32 to vector<2x8xf32>
    %500 = arith.divf %499, %498 : vector<2x8xf32>
    %501 = vector.extract_strided_slice %199 {offsets = [0, 16], sizes = [2, 8], strides = [1, 1]} : vector<2x24xf32> to vector<2x8xf32>
    %502 = vector.extract_strided_slice %480 {offsets = [0, 16], sizes = [2, 8], strides = [1, 1]} : vector<2x24xf32> to vector<2x8xf32>
    %503 = arith.mulf %490, %502 : vector<2x8xf32>
    %504 = arith.addf %501, %503 : vector<2x8xf32>
    %505 = math.tanh %504 : vector<2x8xf32>
    %cst_156 = arith.constant 1.000000e+00 : f32
    %506 = vector.broadcast %cst_156 : f32 to vector<2x8xf32>
    %507 = arith.subf %506, %500 : vector<2x8xf32>
    %508 = arith.mulf %507, %505 : vector<2x8xf32>
    %509 = arith.mulf %500, %472 : vector<2x8xf32>
    %510 = arith.addf %508, %509 : vector<2x8xf32>
    %511 = vector.extract_strided_slice %313 {offsets = [0, 32], sizes = [2, 8], strides = [1, 1]} : vector<2x64xf32> to vector<2x8xf32>
    %512 = arith.addf %510, %511 : vector<2x8xf32>
    %c4 = arith.constant 4 : index
    %c0_157 = arith.constant 0 : index
    %c0_158 = arith.constant 0 : index
    %513 = vector.load %arg15[%c4, %c0_157, %c0_158] : memref<8x2x8xf32, #tpu.memory_space<vmem>>, vector<1x2x8xf32>
    %514 = vector.shape_cast %513 : vector<1x2x8xf32> to vector<2x8xf32>
    %515 = vector.shape_cast %512 : vector<2x8xf32> to vector<1x2x8xf32>
    tpu.vector_store %arg15[%c4, %c0_157, %c0_158], %515 {strides = array<i32>} : memref<8x2x8xf32, #tpu.memory_space<vmem>>, vector<1x2x8xf32>,
    %cst_159 = arith.constant dense<0.000000e+00> : vector<2x24xf32>
    %516 = tpu.matmul %510, %324, %cst_159 {dimension_numbers = #tpu.dot_dimension_numbers<[1], [0], [0], [1], [0, 0, 1, 1], [], []>} : vector<2x8xf32>, vector<8x24xf32>, vector<2x24xf32> -> vector<2x24xf32>
    %517 = vector.broadcast %325 : vector<1x24xf32> to vector<2x24xf32>
    %518 = arith.addf %516, %517 : vector<2x24xf32>
    %519 = vector.extract_strided_slice %235 {offsets = [0, 0], sizes = [2, 8], strides = [1, 1]} : vector<2x24xf32> to vector<2x8xf32>
    %520 = vector.extract_strided_slice %518 {offsets = [0, 0], sizes = [2, 8], strides = [1, 1]} : vector<2x24xf32> to vector<2x8xf32>
    %521 = arith.addf %519, %520 : vector<2x8xf32>
    %cst_160 = arith.constant 0.000000e+00 : f32
    %522 = vector.broadcast %cst_160 : f32 to vector<2x8xf32>
    %523 = arith.subf %522, %521 : vector<2x8xf32>
    %524 = math.exp %523 : vector<2x8xf32>
    %cst_161 = arith.constant 1.000000e+00 : f32
    %525 = vector.broadcast %cst_161 : f32 to vector<2x8xf32>
    %526 = arith.addf %525, %524 : vector<2x8xf32>
    %cst_162 = arith.constant 1.000000e+00 : f32
    %527 = vector.broadcast %cst_162 : f32 to vector<2x8xf32>
    %528 = arith.divf %527, %526 : vector<2x8xf32>
    %529 = vector.extract_strided_slice %235 {offsets = [0, 8], sizes = [2, 8], strides = [1, 1]} : vector<2x24xf32> to vector<2x8xf32>
    %530 = vector.extract_strided_slice %518 {offsets = [0, 8], sizes = [2, 8], strides = [1, 1]} : vector<2x24xf32> to vector<2x8xf32>
    %531 = arith.addf %529, %530 : vector<2x8xf32>
    %cst_163 = arith.constant 0.000000e+00 : f32
    %532 = vector.broadcast %cst_163 : f32 to vector<2x8xf32>
    %533 = arith.subf %532, %531 : vector<2x8xf32>
    %534 = math.exp %533 : vector<2x8xf32>
    %cst_164 = arith.constant 1.000000e+00 : f32
    %535 = vector.broadcast %cst_164 : f32 to vector<2x8xf32>
    %536 = arith.addf %535, %534 : vector<2x8xf32>
    %cst_165 = arith.constant 1.000000e+00 : f32
    %537 = vector.broadcast %cst_165 : f32 to vector<2x8xf32>
    %538 = arith.divf %537, %536 : vector<2x8xf32>
    %539 = vector.extract_strided_slice %235 {offsets = [0, 16], sizes = [2, 8], strides = [1, 1]} : vector<2x24xf32> to vector<2x8xf32>
    %540 = vector.extract_strided_slice %518 {offsets = [0, 16], sizes = [2, 8], strides = [1, 1]} : vector<2x24xf32> to vector<2x8xf32>
    %541 = arith.mulf %528, %540 : vector<2x8xf32>
    %542 = arith.addf %539, %541 : vector<2x8xf32>
    %543 = math.tanh %542 : vector<2x8xf32>
    %cst_166 = arith.constant 1.000000e+00 : f32
    %544 = vector.broadcast %cst_166 : f32 to vector<2x8xf32>
    %545 = arith.subf %544, %538 : vector<2x8xf32>
    %546 = arith.mulf %545, %543 : vector<2x8xf32>
    %547 = arith.mulf %538, %510 : vector<2x8xf32>
    %548 = arith.addf %546, %547 : vector<2x8xf32>
    %549 = vector.extract_strided_slice %313 {offsets = [0, 40], sizes = [2, 8], strides = [1, 1]} : vector<2x64xf32> to vector<2x8xf32>
    %550 = arith.addf %548, %549 : vector<2x8xf32>
    %c5 = arith.constant 5 : index
    %c0_167 = arith.constant 0 : index
    %c0_168 = arith.constant 0 : index
    %551 = vector.load %arg15[%c5, %c0_167, %c0_168] : memref<8x2x8xf32, #tpu.memory_space<vmem>>, vector<1x2x8xf32>
    %552 = vector.shape_cast %551 : vector<1x2x8xf32> to vector<2x8xf32>
    %553 = vector.shape_cast %550 : vector<2x8xf32> to vector<1x2x8xf32>
    tpu.vector_store %arg15[%c5, %c0_167, %c0_168], %553 {strides = array<i32>} : memref<8x2x8xf32, #tpu.memory_space<vmem>>, vector<1x2x8xf32>,
    %cst_169 = arith.constant dense<0.000000e+00> : vector<2x24xf32>
    %554 = tpu.matmul %548, %324, %cst_169 {dimension_numbers = #tpu.dot_dimension_numbers<[1], [0], [0], [1], [0, 0, 1, 1], [], []>} : vector<2x8xf32>, vector<8x24xf32>, vector<2x24xf32> -> vector<2x24xf32>
    %555 = vector.broadcast %325 : vector<1x24xf32> to vector<2x24xf32>
    %556 = arith.addf %554, %555 : vector<2x24xf32>
    %557 = vector.extract_strided_slice %271 {offsets = [0, 0], sizes = [2, 8], strides = [1, 1]} : vector<2x24xf32> to vector<2x8xf32>
    %558 = vector.extract_strided_slice %556 {offsets = [0, 0], sizes = [2, 8], strides = [1, 1]} : vector<2x24xf32> to vector<2x8xf32>
    %559 = arith.addf %557, %558 : vector<2x8xf32>
    %cst_170 = arith.constant 0.000000e+00 : f32
    %560 = vector.broadcast %cst_170 : f32 to vector<2x8xf32>
    %561 = arith.subf %560, %559 : vector<2x8xf32>
    %562 = math.exp %561 : vector<2x8xf32>
    %cst_171 = arith.constant 1.000000e+00 : f32
    %563 = vector.broadcast %cst_171 : f32 to vector<2x8xf32>
    %564 = arith.addf %563, %562 : vector<2x8xf32>
    %cst_172 = arith.constant 1.000000e+00 : f32
    %565 = vector.broadcast %cst_172 : f32 to vector<2x8xf32>
    %566 = arith.divf %565, %564 : vector<2x8xf32>
    %567 = vector.extract_strided_slice %271 {offsets = [0, 8], sizes = [2, 8], strides = [1, 1]} : vector<2x24xf32> to vector<2x8xf32>
    %568 = vector.extract_strided_slice %556 {offsets = [0, 8], sizes = [2, 8], strides = [1, 1]} : vector<2x24xf32> to vector<2x8xf32>
    %569 = arith.addf %567, %568 : vector<2x8xf32>
    %cst_173 = arith.constant 0.000000e+00 : f32
    %570 = vector.broadcast %cst_173 : f32 to vector<2x8xf32>
    %571 = arith.subf %570, %569 : vector<2x8xf32>
    %572 = math.exp %571 : vector<2x8xf32>
    %cst_174 = arith.constant 1.000000e+00 : f32
    %573 = vector.broadcast %cst_174 : f32 to vector<2x8xf32>
    %574 = arith.addf %573, %572 : vector<2x8xf32>
    %cst_175 = arith.constant 1.000000e+00 : f32
    %575 = vector.broadcast %cst_175 : f32 to vector<2x8xf32>
    %576 = arith.divf %575, %574 : vector<2x8xf32>
    %577 = vector.extract_strided_slice %271 {offsets = [0, 16], sizes = [2, 8], strides = [1, 1]} : vector<2x24xf32> to vector<2x8xf32>
    %578 = vector.extract_strided_slice %556 {offsets = [0, 16], sizes = [2, 8], strides = [1, 1]} : vector<2x24xf32> to vector<2x8xf32>
    %579 = arith.mulf %566, %578 : vector<2x8xf32>
    %580 = arith.addf %577, %579 : vector<2x8xf32>
    %581 = math.tanh %580 : vector<2x8xf32>
    %cst_176 = arith.constant 1.000000e+00 : f32
    %582 = vector.broadcast %cst_176 : f32 to vector<2x8xf32>
    %583 = arith.subf %582, %576 : vector<2x8xf32>
    %584 = arith.mulf %583, %581 : vector<2x8xf32>
    %585 = arith.mulf %576, %548 : vector<2x8xf32>
    %586 = arith.addf %584, %585 : vector<2x8xf32>
    %587 = vector.extract_strided_slice %313 {offsets = [0, 48], sizes = [2, 8], strides = [1, 1]} : vector<2x64xf32> to vector<2x8xf32>
    %588 = arith.addf %586, %587 : vector<2x8xf32>
    %c6 = arith.constant 6 : index
    %c0_177 = arith.constant 0 : index
    %c0_178 = arith.constant 0 : index
    %589 = vector.load %arg15[%c6, %c0_177, %c0_178] : memref<8x2x8xf32, #tpu.memory_space<vmem>>, vector<1x2x8xf32>
    %590 = vector.shape_cast %589 : vector<1x2x8xf32> to vector<2x8xf32>
    %591 = vector.shape_cast %588 : vector<2x8xf32> to vector<1x2x8xf32>
    tpu.vector_store %arg15[%c6, %c0_177, %c0_178], %591 {strides = array<i32>} : memref<8x2x8xf32, #tpu.memory_space<vmem>>, vector<1x2x8xf32>,
    %cst_179 = arith.constant dense<0.000000e+00> : vector<2x24xf32>
    %592 = tpu.matmul %586, %324, %cst_179 {dimension_numbers = #tpu.dot_dimension_numbers<[1], [0], [0], [1], [0, 0, 1, 1], [], []>} : vector<2x8xf32>, vector<8x24xf32>, vector<2x24xf32> -> vector<2x24xf32>
    %593 = vector.broadcast %325 : vector<1x24xf32> to vector<2x24xf32>
    %594 = arith.addf %592, %593 : vector<2x24xf32>
    %595 = vector.extract_strided_slice %307 {offsets = [0, 0], sizes = [2, 8], strides = [1, 1]} : vector<2x24xf32> to vector<2x8xf32>
    %596 = vector.extract_strided_slice %594 {offsets = [0, 0], sizes = [2, 8], strides = [1, 1]} : vector<2x24xf32> to vector<2x8xf32>
    %597 = arith.addf %595, %596 : vector<2x8xf32>
    %cst_180 = arith.constant 0.000000e+00 : f32
    %598 = vector.broadcast %cst_180 : f32 to vector<2x8xf32>
    %599 = arith.subf %598, %597 : vector<2x8xf32>
    %600 = math.exp %599 : vector<2x8xf32>
    %cst_181 = arith.constant 1.000000e+00 : f32
    %601 = vector.broadcast %cst_181 : f32 to vector<2x8xf32>
    %602 = arith.addf %601, %600 : vector<2x8xf32>
    %cst_182 = arith.constant 1.000000e+00 : f32
    %603 = vector.broadcast %cst_182 : f32 to vector<2x8xf32>
    %604 = arith.divf %603, %602 : vector<2x8xf32>
    %605 = vector.extract_strided_slice %307 {offsets = [0, 8], sizes = [2, 8], strides = [1, 1]} : vector<2x24xf32> to vector<2x8xf32>
    %606 = vector.extract_strided_slice %594 {offsets = [0, 8], sizes = [2, 8], strides = [1, 1]} : vector<2x24xf32> to vector<2x8xf32>
    %607 = arith.addf %605, %606 : vector<2x8xf32>
    %cst_183 = arith.constant 0.000000e+00 : f32
    %608 = vector.broadcast %cst_183 : f32 to vector<2x8xf32>
    %609 = arith.subf %608, %607 : vector<2x8xf32>
    %610 = math.exp %609 : vector<2x8xf32>
    %cst_184 = arith.constant 1.000000e+00 : f32
    %611 = vector.broadcast %cst_184 : f32 to vector<2x8xf32>
    %612 = arith.addf %611, %610 : vector<2x8xf32>
    %cst_185 = arith.constant 1.000000e+00 : f32
    %613 = vector.broadcast %cst_185 : f32 to vector<2x8xf32>
    %614 = arith.divf %613, %612 : vector<2x8xf32>
    %615 = vector.extract_strided_slice %307 {offsets = [0, 16], sizes = [2, 8], strides = [1, 1]} : vector<2x24xf32> to vector<2x8xf32>
    %616 = vector.extract_strided_slice %594 {offsets = [0, 16], sizes = [2, 8], strides = [1, 1]} : vector<2x24xf32> to vector<2x8xf32>
    %617 = arith.mulf %604, %616 : vector<2x8xf32>
    %618 = arith.addf %615, %617 : vector<2x8xf32>
    %619 = math.tanh %618 : vector<2x8xf32>
    %cst_186 = arith.constant 1.000000e+00 : f32
    %620 = vector.broadcast %cst_186 : f32 to vector<2x8xf32>
    %621 = arith.subf %620, %614 : vector<2x8xf32>
    %622 = arith.mulf %621, %619 : vector<2x8xf32>
    %623 = arith.mulf %614, %586 : vector<2x8xf32>
    %624 = arith.addf %622, %623 : vector<2x8xf32>
    %625 = vector.extract_strided_slice %313 {offsets = [0, 56], sizes = [2, 8], strides = [1, 1]} : vector<2x64xf32> to vector<2x8xf32>
    %626 = arith.addf %624, %625 : vector<2x8xf32>
    %c7 = arith.constant 7 : index
    %c0_187 = arith.constant 0 : index
    %c0_188 = arith.constant 0 : index
    %627 = vector.load %arg15[%c7, %c0_187, %c0_188] : memref<8x2x8xf32, #tpu.memory_space<vmem>>, vector<1x2x8xf32>
    %628 = vector.shape_cast %627 : vector<1x2x8xf32> to vector<2x8xf32>
    %629 = vector.shape_cast %626 : vector<2x8xf32> to vector<1x2x8xf32>
    tpu.vector_store %arg15[%c7, %c0_187, %c0_188], %629 {strides = array<i32>} : memref<8x2x8xf32, #tpu.memory_space<vmem>>, vector<1x2x8xf32>,
    return
  }
}

</mosaic_0001>

<bundles_post_ra>
// kernel: crazy_rnn_seq_decoder.1
= control target key start
LH: loop header
LB: loop body
LE: loop exit
PB: predicated region body
PF: predicated region fallthrough
CT: control target
= control target key end

     0   :  { %v3193_v1 = vmov 0.0   ;;  %vm3194_vm0 = vmmov 0   ;;  %s3835_s0 = inlined_call_operand.vmem [shape: f32[2,16], index: 0, kind: input, shape index: {}]   ;;  %s3836_s1 = inlined_call_operand.vmem [shape: f32[16,16], index: 1, kind: input, shape index: {}]   ;;  %s3837_s2 = inlined_call_operand.vmem [shape: f32[1,16], index: 2, kind: input, shape index: {}]   ;;  %s3838_s3 = inlined_call_operand.vmem [shape: f32[16,8], index: 3, kind: input, shape index: {}]   ;;  %s3839_s4 = inlined_call_operand.vmem [shape: f32[1,8], index: 4, kind: input, shape index: {}]   ;;  %s3840_s5 = inlined_call_operand.vmem [shape: f32[16,48], index: 5, kind: input, shape index: {}]   ;;  %s3841_s6 = inlined_call_operand.vmem [shape: f32[16,48], index: 6, kind: input, shape index: {}]   ;;  %s3842_s7 = inlined_call_operand.vmem [shape: f32[1,48], index: 7, kind: input, shape index: {}]   ;;  %s3843_s8 = inlined_call_operand.vmem [shape: f32[1,48], index: 8, kind: input, shape index: {}]   ;;  %s3844_s9 = inlined_call_operand.vmem [shape: f32[16,24], index: 9, kind: input, shape index: {}]   ;;  %s3845_s10 = inlined_call_operand.vmem [shape: f32[8,24], index: 10, kind: input, shape index: {}]   ;;  %s3846_s11 = inlined_call_operand.vmem [shape: f32[1,24], index: 11, kind: input, shape index: {}]   ;;  %s3847_s12 = inlined_call_operand.vmem [shape: f32[1,24], index: 12, kind: input, shape index: {}]   ;;  %s3848_s13 = inlined_call_operand.vmem [shape: f32[128,64], index: 13, kind: input, shape index: {}]   ;;  %s3849_s14 = inlined_call_operand.vmem [shape: f32[1,64], index: 14, kind: input, shape index: {}]   ;;  %s3850_s15 = inlined_call_operand.hbm [shape: f32[8,2,8], index: 15, kind: output, shape index: {}]  }
   0x1   :  { %v53_v0 = vld [vmem:[%s3836_s1 + $0x8] sm:$0xff]  ;;  %2852 = vmatprep.subr.mxu0 %v3193_v1  ;;  %v52_v2 = vld [vmem:[%s3836_s1] sm:$0xff]  ;;  %2856 = vmatprep.mubr.msk.f32.mxu0 %vm3194_vm0, %v3193_v1 }
   0x2   :  { %20 = vsyncpa [#allocation3], 0  ;;  %2853 = vmatpush3.msra.mxu0 %v53_v0  ;;  %v51_v3 = vld [vmem:[%s3835_s0] sm:$0x3]  ;;  %vm61_vm1 = vcmask 130048   ;;  %2859 = vmatprep.subr.mxu1 %v3193_v1  ;;  %v3311_v4 = vld [vmem:[%s3841_s6 + $0x8] sm:$0xff] }
   0x3   :  { %2854 = vmatprep.subr.mxu0 %v3193_v1  ;;  %2863 = vmatprep.mubr.msk.f32.mxu1 %vm3194_vm0, %v3193_v1  ;;  %v139_v5 = vld [vmem:[%s3840_s5 + $0x8] sm:$0xff]  ;;  %v3322_v6 = vld [vmem:[%s3841_s6] sm:$0xff]  ;;  %s3195_s6 = smov 96   ;;  %s3197_s22 = smov 112   ;;  %vm1824_vm4 = vcmask 64512   ;;  %vm1629_vm5 = vcmask 261120  }
   0x4   :  { %2855 = vmatpush3.msra.mxu0 %v52_v2  ;;  %2860 = vmatpush3.msra.mxu1 %v139_v5  ;;  %v138_v7 = vld [vmem:[%s3840_s5] sm:$0xff]  ;;  %v3361_v32 = vld [vmem:[%s3844_s9 + $0x8] sm:$0xff]  ;;  %s3198_s23 = smov 16   ;;  %s3201_s30 = smov 48   ;;  %vm1631_vm6 = vcmask 392192   ;;  %vm1633_vm7 = vcmask 523264  }
   0x5   :  { %2857 = vmatmul.mubr.msk.f32.vlgmr.msra.gmra.mxu0 %vm61_vm1, %v51_v3  ;;  %2866 = vmatprep.subr.mxu0 %v3193_v1  ;;  %v2728_v8 = vld [vmem:[%s3837_s2] ss:$0 sm:$0xff]  ;;  %s3202_s16 = smov 80   ;;  %s3203_s0 = smov 64   ;;  %vm1635_vm8 = vcmask 654336   ;;  %vm1637_vm9 = vcmask 785408  }
   0x6   :  { %2870 = vmatprep.mubr.msk.f32.mxu0 %vm3194_vm0, %v3193_v1  ;;  %2867 = vmatpush3.msra.mxu0 %v3311_v4  ;;  %v3346_v16 = vld [vmem:[%s3843_s8] ss:$0 sm:$0xff]  ;;  %s3196_s8 = smov 32   ;;  %vm1639_vm10 = vcmask 916480   ;;  %s3204_s26 = smov 104   ;;  %vm1936_vm11 = vcmask 58368  }
   0x7   :  { %2868 = vmatprep.subr.mxu0 %v3193_v1  ;;  %2861 = vmatprep.subr.mxu1 %v3193_v1  ;;  %v2730_v20 = vld [vmem:[%s3842_s7] ss:$0 sm:$0xff] }
   0x8   :  { %2869 = vmatpush3.msra.mxu0 %v3322_v6  ;;  %2862 = vmatpush3.msra.mxu1 %v138_v7  ;;  %v3366_v33 = vld [vmem:[%s3844_s9] sm:$0xff] }
   0x9   :  { %2864 = vmatmul.mubr.msk.f32.vlgmr.msra.gmra.mxu1 %vm61_vm1, %v51_v3  ;;  %2880 = vmatprep.subr.mxu0 %v3193_v1 }
   0xa   :  { %2873 = vmatprep.subr.mxu1 %v3193_v1  ;;  %2877 = vmatprep.mubr.msk.f32.mxu1 %vm3194_vm0, %v3193_v1 }
   0xb   :  { %2874 = vmatpush3.msra.mxu1 %v3361_v32 }
   0xc   :  { %2875 = vmatprep.subr.mxu1 %v3193_v1 }
   0xd   :  { %2876 = vmatpush3.msra.mxu1 %v3366_v33 }
   0xe   :  { %2887 = vmatprep.subr.mxu1 %v3193_v1 }
  0xc5   :  { %v131_v9 = vpop.f32.mrf.mxu0 }
  0xc6   :  { %v132_v10 = vadd.f32 %v2728_v8, %v131_v9 }
  0xc7   :  { %v2858_v11 = vpop.f32.mrf.mxu0 }
  0xc8   :  { %vm135_vm2 = vcmp.gt.f32.partialorder %v132_v10, 0.0  ;;  %v136_v12 = vmul.f32 0.2, %v132_v10 }
  0xc9   :  { %v213_v14 = vpop.f32.mrf.mxu1 }
  0xca   :  { %v137_v13 = vsel %vm135_vm2, %v132_v10, %v136_v12  ;;  %v3353_v21 = vadd.f32 %v2730_v20, %v213_v14 }
  0xcb   :  { %2871 = vmatmul.mubr.msk.f32.vlgmr.msra.gmra.mxu0 %vm61_vm1, %v137_v13  ;;  %v2865_v15 = vpop.f32.mrf.mxu1 }
  0xcc   :  { %2881 = vmatpush3.msra.mxu0 %v3311_v4  ;;  %2884 = vmatprep.mubr.msk.f32.mxu0 %vm3194_vm0, %v3193_v1 }
  0xcd   :  { %2882 = vmatprep.subr.mxu0 %v3193_v1 }
  0xce   :  { %2883 = vmatpush3.msra.mxu0 %v3322_v6 }
  0xcf   :  { %2894 = vmatprep.subr.mxu0 %v3193_v1 }
 0x18b   :  { %v298_v17 = vpop.f32.mrf.mxu0 }
 0x18c   :  { %v299_v18 = vadd.f32 %v3346_v16, %v298_v17 }
 0x18d   :  { %v2872_v19 = vpop.f32.mrf.mxu0 }
 0x18e   :  { %310 = vrot.lane.b32.xlu0 %v299_v18, %s3195_s6  ;;  %v302_v22 = vadd.f32 %v299_v18, %v3353_v21 }
 0x190   :  { %v303_v23 = vsub.f32 0.0, %v302_v22 }
 0x192   :  { %v304_v24 = vmul.f32 1.442695, %v303_v23 }
 0x194   :  { %3075 = vpow2.f32 %v304_v24 }
 0x1a1   :  { %v3076_v25 = vpop.eup %3075 }
 0x1a2   :  { %v306_v26 = vadd.f32 1.0, %v3076_v25 }
 0x1a4   :  { %3077 = vrcp.f32 %v306_v26 }
 0x1b1   :  { %v3078_v27 = vpop.eup %3077 }
 0x1b2   :  { %v320_v36 = vsub.f32 1.0, %v3078_v27 }
 0x200   :  { %v311_v28 = vpop.permute.xlu0 %310 }
 0x201   :  { %v313_v29 = vmul.f32 %v3078_v27, %v311_v28 }
 0x203   :  { %315 = vrot.lane.b32.xlu0 %v313_v29, %s3196_s8 }
 0x275   :  { %v316_v30 = vpop.permute.xlu0 %315 }
 0x276   :  { %v318_v31 = vadd.f32 %v316_v30, %v3353_v21 }
 0x278   :  { %3079 = vtanh.f32 %v318_v31 }
 0x285   :  { %v3080_v34 = vpop.eup %3079 }
 0x286   :  { %322 = vrot.lane.b32.xlu1 %v3080_v34, %s3197_s22 }
 0x28a   :  { %326 = vrot.lane.b32.xlu1 %v137_v13, %s3198_s23 }
 0x2f8   :  { %v323_v35 = vpop.permute.xlu1 %322 }
 0x2f9   :  { %v325_v38 = vmul.f32 %v323_v35, %v320_v36 }
 0x2fc   :  { %v327_v37 = vpop.permute.xlu1 %326 }
 0x2fd   :  { %v329_v39 = vmul.f32 %v3078_v27, %v327_v37 }
 0x2ff   :  { %v330_v40 = vadd.f32 %v329_v39, %v325_v38 }
 0x301   :  { %338 = vrot.lane.b32.xlu0 %v330_v40, %s3197_s22 }
 0x373   :  { %v3375_v41 = vpop.permute.xlu0 %338 }
 0x374   :  { %2878 = vmatmul.mubr.msk.f32.vlgmr.msra.gmra.mxu1 %vm61_vm1, %v3375_v41  ;;  %2885 = vmatmul.mubr.msk.f32.vlgmr.msra.gmra.mxu0 %vm61_vm1, %v3375_v41 }
 0x375   :  { %2895 = vmatpush3.msra.mxu0 %v3311_v4  ;;  %2888 = vmatpush3.msra.mxu1 %v3361_v32 }
 0x376   :  { %2896 = vmatprep.subr.mxu0 %v3193_v1  ;;  %2889 = vmatprep.subr.mxu1 %v3193_v1 }
 0x377   :  { %2897 = vmatpush3.msra.mxu0 %v3322_v6  ;;  %2890 = vmatpush3.msra.mxu1 %v3366_v33 }
 0x378   :  { %2891 = vmatprep.mubr.msk.f32.mxu1 %vm3194_vm0, %v3193_v1  ;;  %2898 = vmatprep.mubr.msk.f32.mxu0 %vm3194_vm0, %v3193_v1 }
 0x379   :  { %2908 = vmatprep.subr.mxu0 %v3193_v1  ;;  %2901 = vmatprep.subr.mxu1 %v3193_v1 }
 0x434   :  { %v3393_v42 = vpop.f32.mrf.mxu1  ;;  %v478_v43 = vpop.f32.mrf.mxu0 }
 0x435   :  { %v479_v44 = vadd.f32 %v3346_v16, %v478_v43 }
 0x436   :  { %v2879_v45 = vpop.f32.mrf.mxu1  ;;  %v2886_v46 = vpop.f32.mrf.mxu0 }
 0x437   :  { %490 = vrot.lane.b32.xlu1 %v479_v44, %s3195_s6  ;;  %v482_v47 = vadd.f32 %v479_v44, %v3353_v21 }
 0x439   :  { %v483_v48 = vsub.f32 0.0, %v482_v47 }
 0x43b   :  { %v484_v49 = vmul.f32 1.442695, %v483_v48 }
 0x43d   :  { %3081 = vpow2.f32 %v484_v49 }
 0x44a   :  { %v3082_v50 = vpop.eup %3081 }
 0x44b   :  { %v486_v51 = vadd.f32 1.0, %v3082_v50 }
 0x44d   :  { %3083 = vrcp.f32 %v486_v51 }
 0x45a   :  { %v3084_v52 = vpop.eup %3083 }
 0x45b   :  { %v500_v58 = vsub.f32 1.0, %v3084_v52  ;;  %v506_v60 = vmul.f32 %v3084_v52, %v330_v40 }
 0x4a9   :  { %v491_v53 = vpop.permute.xlu1 %490 }
 0x4aa   :  { %v493_v54 = vmul.f32 %v3084_v52, %v491_v53 }
 0x4ac   :  { %495 = vrot.lane.b32.xlu0 %v493_v54, %s3196_s8 }
 0x51e   :  { %v496_v55 = vpop.permute.xlu0 %495 }
 0x51f   :  { %v498_v56 = vadd.f32 %v496_v55, %v3353_v21 }
 0x521   :  { %3085 = vtanh.f32 %v498_v56 }
 0x52e   :  { %v3086_v57 = vpop.eup %3085 }
 0x52f   :  { %502 = vrot.lane.b32.xlu1 %v3086_v57, %s3197_s22 }
 0x5a1   :  { %v503_v59 = vpop.permute.xlu1 %502 }
 0x5a2   :  { %v505_v61 = vmul.f32 %v503_v59, %v500_v58 }
 0x5a4   :  { %v3401_v62 = vadd.f32 %v506_v60, %v505_v61 }
 0x5a6   :  { %509 = vrot.lane.b32.xlu0 %v3401_v62, %s3197_s22 }
 0x618   :  { %v510_v63 = vpop.permute.xlu0 %509 }
 0x619   :  { %2892 = vmatmul.mubr.msk.f32.vlgmr.msra.gmra.mxu1 %vm61_vm1, %v510_v63  ;;  %2899 = vmatmul.mubr.msk.f32.vlgmr.msra.gmra.mxu0 %vm61_vm1, %v510_v63 }
 0x61a   :  { %2909 = vmatpush3.msra.mxu0 %v3311_v4  ;;  %2902 = vmatpush3.msra.mxu1 %v3361_v32 }
 0x61b   :  { %2910 = vmatprep.subr.mxu0 %v3193_v1  ;;  %2903 = vmatprep.subr.mxu1 %v3193_v1 }
 0x61c   :  { %2911 = vmatpush3.msra.mxu0 %v3322_v6  ;;  %2904 = vmatpush3.msra.mxu1 %v3366_v33 }
 0x61d   :  { %2905 = vmatprep.mubr.msk.f32.mxu1 %vm3194_vm0, %v3193_v1  ;;  %2912 = vmatprep.mubr.msk.f32.mxu0 %vm3194_vm0, %v3193_v1 }
 0x61e   :  { %2922 = vmatprep.subr.mxu0 %v3193_v1  ;;  %2915 = vmatprep.subr.mxu1 %v3193_v1 }
 0x6d9   :  { %v3419_v0 = vpop.f32.mrf.mxu1  ;;  %v649_v2 = vpop.f32.mrf.mxu0 }
 0x6da   :  { %v650_v3 = vadd.f32 %v3346_v16, %v649_v2 }
 0x6db   :  { %v2893_v5 = vpop.f32.mrf.mxu1  ;;  %v2900_v7 = vpop.f32.mrf.mxu0 }
 0x6dc   :  { %661 = vrot.lane.b32.xlu1 %v650_v3, %s3195_s6  ;;  %v653_v8 = vadd.f32 %v650_v3, %v3353_v21 }
 0x6de   :  { %v654_v9 = vsub.f32 0.0, %v653_v8 }
 0x6e0   :  { %v655_v10 = vmul.f32 1.442695, %v654_v9 }
 0x6e2   :  { %3087 = vpow2.f32 %v655_v10 }
 0x6ef   :  { %v3088_v11 = vpop.eup %3087 }
 0x6f0   :  { %v657_v12 = vadd.f32 1.0, %v3088_v11 }
 0x6f2   :  { %3089 = vrcp.f32 %v657_v12 }
 0x6ff   :  { %v3090_v13 = vpop.eup %3089 }
 0x700   :  { %v671_v20 = vsub.f32 1.0, %v3090_v13  ;;  %v677_v23 = vmul.f32 %v3090_v13, %v3401_v62 }
 0x74e   :  { %v662_v14 = vpop.permute.xlu1 %661 }
 0x74f   :  { %v664_v15 = vmul.f32 %v3090_v13, %v662_v14 }
 0x751   :  { %666 = vrot.lane.b32.xlu0 %v664_v15, %s3196_s8 }
 0x7c3   :  { %v667_v17 = vpop.permute.xlu0 %666 }
 0x7c4   :  { %v669_v18 = vadd.f32 %v667_v17, %v3353_v21 }
 0x7c6   :  { %3091 = vtanh.f32 %v669_v18 }
 0x7d3   :  { %v3092_v19 = vpop.eup %3091 }
 0x7d4   :  { %673 = vrot.lane.b32.xlu1 %v3092_v19, %s3197_s22 }
 0x846   :  { %v674_v22 = vpop.permute.xlu1 %673 }
 0x847   :  { %v676_v24 = vmul.f32 %v674_v22, %v671_v20 }
 0x849   :  { %v3428_v25 = vadd.f32 %v677_v23, %v676_v24 }
 0x84b   :  { %680 = vrot.lane.b32.xlu0 %v3428_v25, %s3197_s22 }
 0x8bd   :  { %v681_v26 = vpop.permute.xlu0 %680 }
 0x8be   :  { %2906 = vmatmul.mubr.msk.f32.vlgmr.msra.gmra.mxu1 %vm61_vm1, %v681_v26  ;;  %2913 = vmatmul.mubr.msk.f32.vlgmr.msra.gmra.mxu0 %vm61_vm1, %v681_v26 }
 0x8bf   :  { %2923 = vmatpush3.msra.mxu0 %v3311_v4  ;;  %2916 = vmatpush3.msra.mxu1 %v3361_v32 }
 0x8c0   :  { %2924 = vmatprep.subr.mxu0 %v3193_v1  ;;  %2917 = vmatprep.subr.mxu1 %v3193_v1 }
 0x8c1   :  { %2925 = vmatpush3.msra.mxu0 %v3322_v6  ;;  %2918 = vmatpush3.msra.mxu1 %v3366_v33 }
 0x8c2   :  { %2919 = vmatprep.mubr.msk.f32.mxu1 %vm3194_vm0, %v3193_v1  ;;  %2926 = vmatprep.mubr.msk.f32.mxu0 %vm3194_vm0, %v3193_v1 }
 0x8c3   :  { %2936 = vmatprep.subr.mxu0 %v3193_v1  ;;  %2929 = vmatprep.subr.mxu1 %v3193_v1 }
 0x97e   :  { %v3446_v27 = vpop.f32.mrf.mxu1  ;;  %v820_v28 = vpop.f32.mrf.mxu0 }
 0x97f   :  { %v821_v29 = vadd.f32 %v3346_v16, %v820_v28 }
 0x980   :  { %v2907_v30 = vpop.f32.mrf.mxu1  ;;  %v2914_v31 = vpop.f32.mrf.mxu0 }
 0x981   :  { %832 = vrot.lane.b32.xlu1 %v821_v29, %s3195_s6  ;;  %v824_v34 = vadd.f32 %v821_v29, %v3353_v21 }
 0x983   :  { %v825_v35 = vsub.f32 0.0, %v824_v34 }
 0x985   :  { %v826_v36 = vmul.f32 1.442695, %v825_v35 }
 0x987   :  { %3093 = vpow2.f32 %v826_v36 }
 0x994   :  { %v3094_v37 = vpop.eup %3093 }
 0x995   :  { %v828_v38 = vadd.f32 1.0, %v3094_v37 }
 0x997   :  { %3095 = vrcp.f32 %v828_v38 }
 0x9a4   :  { %v3096_v39 = vpop.eup %3095 }
 0x9a5   :  { %v842_v47 = vsub.f32 1.0, %v3096_v39  ;;  %v848_v49 = vmul.f32 %v3096_v39, %v3428_v25 }
 0x9f3   :  { %v833_v40 = vpop.permute.xlu1 %832 }
 0x9f4   :  { %v835_v43 = vmul.f32 %v3096_v39, %v833_v40 }
 0x9f6   :  { %837 = vrot.lane.b32.xlu0 %v835_v43, %s3196_s8 }
 0xa68   :  { %v838_v44 = vpop.permute.xlu0 %837 }
 0xa69   :  { %v840_v45 = vadd.f32 %v838_v44, %v3353_v21 }
 0xa6b   :  { %3097 = vtanh.f32 %v840_v45 }
 0xa78   :  { %v3098_v46 = vpop.eup %3097 }
 0xa79   :  { %844 = vrot.lane.b32.xlu1 %v3098_v46, %s3197_s22 }
 0xaeb   :  { %v845_v48 = vpop.permute.xlu1 %844 }
 0xaec   :  { %v847_v50 = vmul.f32 %v845_v48, %v842_v47 }
 0xaee   :  { %v3455_v51 = vadd.f32 %v848_v49, %v847_v50 }
 0xaf0   :  { %851 = vrot.lane.b32.xlu0 %v3455_v51, %s3197_s22 }
 0xb62   :  { %v852_v52 = vpop.permute.xlu0 %851 }
 0xb63   :  { %2920 = vmatmul.mubr.msk.f32.vlgmr.msra.gmra.mxu1 %vm61_vm1, %v852_v52  ;;  %2927 = vmatmul.mubr.msk.f32.vlgmr.msra.gmra.mxu0 %vm61_vm1, %v852_v52 }
 0xb64   :  { %2937 = vmatpush3.msra.mxu0 %v3311_v4  ;;  %2930 = vmatpush3.msra.mxu1 %v3361_v32 }
 0xb65   :  { %2938 = vmatprep.subr.mxu0 %v3193_v1  ;;  %2931 = vmatprep.subr.mxu1 %v3193_v1 }
 0xb66   :  { %2939 = vmatpush3.msra.mxu0 %v3322_v6  ;;  %2932 = vmatpush3.msra.mxu1 %v3366_v33 }
 0xb67   :  { %2933 = vmatprep.mubr.msk.f32.mxu1 %vm3194_vm0, %v3193_v1  ;;  %2940 = vmatprep.mubr.msk.f32.mxu0 %vm3194_vm0, %v3193_v1 }
 0xb68   :  { %2950 = vmatprep.subr.mxu0 %v3193_v1  ;;  %2943 = vmatprep.subr.mxu1 %v3193_v1 }
 0xc23   :  { %v3473_v53 = vpop.f32.mrf.mxu1  ;;  %v991_v54 = vpop.f32.mrf.mxu0 }
 0xc24   :  { %v992_v55 = vadd.f32 %v3346_v16, %v991_v54 }
 0xc25   :  { %v2921_v56 = vpop.f32.mrf.mxu1  ;;  %v2928_v57 = vpop.f32.mrf.mxu0 }
 0xc26   :  { %1003 = vrot.lane.b32.xlu1 %v992_v55, %s3195_s6  ;;  %v995_v58 = vadd.f32 %v992_v55, %v3353_v21 }
 0xc28   :  { %v996_v59 = vsub.f32 0.0, %v995_v58 }
 0xc2a   :  { %v997_v60 = vmul.f32 1.442695, %v996_v59 }
 0xc2c   :  { %3099 = vpow2.f32 %v997_v60 }
 0xc39   :  { %v3100_v61 = vpop.eup %3099 }
 0xc3a   :  { %v999_v63 = vadd.f32 1.0, %v3100_v61 }
 0xc3c   :  { %3101 = vrcp.f32 %v999_v63 }
 0xc49   :  { %v3102_v2 = vpop.eup %3101 }
 0xc4a   :  { %v1013_v10 = vsub.f32 1.0, %v3102_v2  ;;  %v1019_v12 = vmul.f32 %v3102_v2, %v3455_v51 }
 0xc98   :  { %v1004_v3 = vpop.permute.xlu1 %1003 }
 0xc99   :  { %v1006_v5 = vmul.f32 %v3102_v2, %v1004_v3 }
 0xc9b   :  { %1008 = vrot.lane.b32.xlu0 %v1006_v5, %s3196_s8 }
 0xd0d   :  { %v1009_v7 = vpop.permute.xlu0 %1008 }
 0xd0e   :  { %v1011_v8 = vadd.f32 %v1009_v7, %v3353_v21 }
 0xd10   :  { %3103 = vtanh.f32 %v1011_v8 }
 0xd1d   :  { %v3104_v9 = vpop.eup %3103 }
 0xd1e   :  { %1015 = vrot.lane.b32.xlu1 %v3104_v9, %s3197_s22 }
 0xd90   :  { %v1016_v11 = vpop.permute.xlu1 %1015 }
 0xd91   :  { %v1018_v13 = vmul.f32 %v1016_v11, %v1013_v10 }
 0xd93   :  { %v3482_v14 = vadd.f32 %v1019_v12, %v1018_v13 }
 0xd95   :  { %1022 = vrot.lane.b32.xlu0 %v3482_v14, %s3197_s22 }
 0xe07   :  { %v1023_v15 = vpop.permute.xlu0 %1022 }
 0xe08   :  { %2934 = vmatmul.mubr.msk.f32.vlgmr.msra.gmra.mxu1 %vm61_vm1, %v1023_v15  ;;  %2941 = vmatmul.mubr.msk.f32.vlgmr.msra.gmra.mxu0 %vm61_vm1, %v1023_v15 }
 0xe09   :  { %2951 = vmatpush3.msra.mxu0 %v3311_v4  ;;  %2944 = vmatpush3.msra.mxu1 %v3361_v32 }
 0xe0a   :  { %2952 = vmatprep.subr.mxu0 %v3193_v1  ;;  %2945 = vmatprep.subr.mxu1 %v3193_v1 }
 0xe0b   :  { %2953 = vmatpush3.msra.mxu0 %v3322_v6  ;;  %2946 = vmatpush3.msra.mxu1 %v3366_v33 }
 0xe0c   :  { %2947 = vmatprep.mubr.msk.f32.mxu1 %vm3194_vm0, %v3193_v1  ;;  %2954 = vmatprep.mubr.msk.f32.mxu0 %vm3194_vm0, %v3193_v1 }
 0xe0d   :  { %2964 = vmatprep.subr.mxu0 %v3193_v1  ;;  %2957 = vmatprep.subr.mxu1 %v3193_v1 }
 0xec8   :  { %v3500_v17 = vpop.f32.mrf.mxu1  ;;  %v1162_v18 = vpop.f32.mrf.mxu0 }
 0xec9   :  { %v1163_v19 = vadd.f32 %v3346_v16, %v1162_v18 }
 0xeca   :  { %v2935_v20 = vpop.f32.mrf.mxu1  ;;  %v2942_v22 = vpop.f32.mrf.mxu0 }
 0xecb   :  { %1174 = vrot.lane.b32.xlu1 %v1163_v19, %s3195_s6  ;;  %v1166_v23 = vadd.f32 %v1163_v19, %v3353_v21 }
 0xecd   :  { %v1167_v24 = vsub.f32 0.0, %v1166_v23 }
 0xecf   :  { %v1168_v26 = vmul.f32 1.442695, %v1167_v24 }
 0xed1   :  { %3105 = vpow2.f32 %v1168_v26 }
 0xede   :  { %v3106_v28 = vpop.eup %3105 }
 0xedf   :  { %v1170_v29 = vadd.f32 1.0, %v3106_v28 }
 0xee1   :  { %3107 = vrcp.f32 %v1170_v29 }
 0xeee   :  { %v3108_v30 = vpop.eup %3107 }
 0xeef   :  { %v1184_v38 = vsub.f32 1.0, %v3108_v30  ;;  %v1190_v40 = vmul.f32 %v3108_v30, %v3482_v14 }
 0xf3d   :  { %v1175_v31 = vpop.permute.xlu1 %1174 }
 0xf3e   :  { %v1177_v34 = vmul.f32 %v3108_v30, %v1175_v31 }
 0xf40   :  { %1179 = vrot.lane.b32.xlu0 %v1177_v34, %s3196_s8 }
 0xfb2   :  { %v1180_v35 = vpop.permute.xlu0 %1179 }
 0xfb3   :  { %v1182_v36 = vadd.f32 %v1180_v35, %v3353_v21  ;;  %v1735_v35 = vld [vmem:[%s3838_s3 + $0x8] sm:$0xff] }
 0xfb5   :  { %3109 = vtanh.f32 %v1182_v36 }
 0xfc2   :  { %v3110_v37 = vpop.eup %3109 }
 0xfc3   :  { %1186 = vrot.lane.b32.xlu1 %v3110_v37, %s3197_s22  ;;  %v3580_v37 = vld [vmem:[%s3845_s10] sm:$0xff] }
0x1035   :  { %v1187_v39 = vpop.permute.xlu1 %1186 }
0x1036   :  { %v1189_v43 = vmul.f32 %v1187_v39, %v1184_v38 }
0x1038   :  { %v3509_v44 = vadd.f32 %v1190_v40, %v1189_v43  ;;  %v2751_v40 = vld [vmem:[%s3839_s4] ss:$0 sm:$0xff] }
0x103a   :  { %1193 = vrot.lane.b32.xlu0 %v3509_v44, %s3197_s22 }
0x10ac   :  { %v1194_v45 = vpop.permute.xlu0 %1193 }
0x10ad   :  { %2948 = vmatmul.mubr.msk.f32.vlgmr.msra.gmra.mxu1 %vm61_vm1, %v1194_v45  ;;  %2955 = vmatmul.mubr.msk.f32.vlgmr.msra.gmra.mxu0 %vm61_vm1, %v1194_v45 }
0x10ae   :  { %2965 = vmatpush3.msra.mxu0 %v3311_v4  ;;  %2958 = vmatpush3.msra.mxu1 %v3361_v32 }
0x10af   :  { %2966 = vmatprep.subr.mxu0 %v3193_v1  ;;  %2959 = vmatprep.subr.mxu1 %v3193_v1 }
0x10b0   :  { %2967 = vmatpush3.msra.mxu0 %v3322_v6  ;;  %2960 = vmatpush3.msra.mxu1 %v3366_v33 }
0x10b1   :  { %2961 = vmatprep.mubr.msk.f32.mxu1 %vm3194_vm0, %v3193_v1  ;;  %2968 = vmatprep.mubr.msk.f32.mxu0 %vm3194_vm0, %v3193_v1 }
0x10b2   :  { %2971 = vmatprep.subr.mxu1 %v3193_v1  ;;  %2978 = vmatprep.subr.mxu0 %v3193_v1 }
0x116d   :  { %v3527_v4 = vpop.f32.mrf.mxu1  ;;  %v1333_v46 = vpop.f32.mrf.mxu0 }
0x116e   :  { %v1334_v47 = vadd.f32 %v3346_v16, %v1333_v46 }
0x116f   :  { %v2949_v48 = vpop.f32.mrf.mxu1  ;;  %v2956_v49 = vpop.f32.mrf.mxu0 }
0x1170   :  { %1345 = vrot.lane.b32.xlu1 %v1334_v47, %s3195_s6  ;;  %v1337_v6 = vadd.f32 %v1334_v47, %v3353_v21  ;;  %v3597_v49 = vld [vmem:[%s3847_s12] ss:$0 sm:$0xff]  ;;  %s3199_s12 = smov 8  }
0x1172   :  { %v1338_v50 = vsub.f32 0.0, %v1337_v6 }
0x1174   :  { %v1339_v52 = vmul.f32 1.442695, %v1338_v50 }
0x1176   :  { %3111 = vpow2.f32 %v1339_v52 }
0x1183   :  { %v3112_v54 = vpop.eup %3111 }
0x1184   :  { %v1341_v55 = vadd.f32 1.0, %v3112_v54  ;;  %v3604_v54 = vld [vmem:[%s3846_s11] ss:$0 sm:$0xff]  ;;  %s3200_s11 = smov 120  }
0x1186   :  { %3113 = vrcp.f32 %v1341_v55  ;;  %v409_v55 = vadd.f32 %v3604_v54, %v3393_v42 }
0x1193   :  { %v3114_v56 = vpop.eup %3113 }
0x1194   :  { %v1355_v63 = vsub.f32 1.0, %v3114_v56  ;;  %v1361_v3 = vmul.f32 %v3114_v56, %v3509_v44 }
0x11e2   :  { %v1346_v57 = vpop.permute.xlu1 %1345 }
0x11e3   :  { %v1348_v58 = vmul.f32 %v3114_v56, %v1346_v57 }
0x11e5   :  { %1350 = vrot.lane.b32.xlu0 %v1348_v58, %s3196_s8 }
0x1257   :  { %v1351_v59 = vpop.permute.xlu0 %1350 }
0x1258   :  { %v1353_v60 = vadd.f32 %v1351_v59, %v3353_v21 }
0x125a   :  { %3115 = vtanh.f32 %v1353_v60 }
0x1267   :  { %v3116_v61 = vpop.eup %3115 }
0x1268   :  { %1357 = vrot.lane.b32.xlu1 %v3116_v61, %s3197_s22 }
0x12da   :  { %v1358_v2 = vpop.permute.xlu1 %1357 }
0x12db   :  { %v1360_v5 = vmul.f32 %v1358_v2, %v1355_v63 }
0x12dd   :  { %v3536_v7 = vadd.f32 %v1361_v3, %v1360_v5 }
0x12df   :  { %1364 = vrot.lane.b32.xlu0 %v3536_v7, %s3197_s22 }
0x1351   :  { %v1365_v8 = vpop.permute.xlu0 %1364 }
0x1352   :  { %2962 = vmatmul.mubr.msk.f32.vlgmr.msra.gmra.mxu1 %vm61_vm1, %v1365_v8  ;;  %2969 = vmatmul.mubr.msk.f32.vlgmr.msra.gmra.mxu0 %vm61_vm1, %v1365_v8 }
0x1353   :  { %2972 = vmatpush3.msra.mxu1 %v3361_v32  ;;  %2975 = vmatprep.mubr.msk.f32.mxu1 %vm3194_vm0, %v3193_v1 }
0x1354   :  { %2973 = vmatprep.subr.mxu1 %v3193_v1  ;;  %3010 = vmatprep.mubr.msk.f32.mxu0 %vm3194_vm0, %v3193_v1 }
0x1355   :  { %2974 = vmatpush3.msra.mxu1 %v3366_v33 }
0x1356   :  { %3013 = vmatprep.subr.mxu1 %v3193_v1 }
0x1412   :  { %v3550_v9 = vpop.f32.mrf.mxu1  ;;  %v1504_v10 = vpop.f32.mrf.mxu0 }
0x1413   :  { %v1505_v11 = vadd.f32 %v3346_v16, %v1504_v10 }
0x1414   :  { %v2963_v12 = vpop.f32.mrf.mxu1  ;;  %v2970_v13 = vpop.f32.mrf.mxu0 }
0x1415   :  { %1516 = vrot.lane.b32.xlu1 %v1505_v11, %s3195_s6  ;;  %v1508_v32 = vadd.f32 %v1505_v11, %v3353_v21 }
0x1417   :  { %v1509_v15 = vsub.f32 0.0, %v1508_v32 }
0x1419   :  { %v1510_v18 = vmul.f32 1.442695, %v1509_v15 }
0x141b   :  { %3117 = vpow2.f32 %v1510_v18 }
0x1428   :  { %v3118_v19 = vpop.eup %3117 }
0x1429   :  { %v1512_v20 = vadd.f32 1.0, %v3118_v19 }
0x142b   :  { %3119 = vrcp.f32 %v1512_v20 }
0x1438   :  { %v3120_v33 = vpop.eup %3119 }
0x1439   :  { %v1526_v28 = vsub.f32 1.0, %v3120_v33  ;;  %v1532_v30 = vmul.f32 %v3120_v33, %v3536_v7 }
0x1487   :  { %v1517_v22 = vpop.permute.xlu1 %1516 }
0x1488   :  { %v1519_v23 = vmul.f32 %v3120_v33, %v1517_v22  ;;  %v580_v33 = vadd.f32 %v3604_v54, %v3419_v0 }
0x148a   :  { %1521 = vrot.lane.b32.xlu0 %v1519_v23, %s3196_s8 }
0x14fc   :  { %v1522_v24 = vpop.permute.xlu0 %1521 }
0x14fd   :  { %v1524_v16 = vadd.f32 %v1522_v24, %v3353_v21  ;;  %v1734_v21 = vld [vmem:[%s3838_s3] sm:$0xff] }
0x14ff   :  { %3121 = vtanh.f32 %v1524_v16 }
0x150c   :  { %v3122_v26 = vpop.eup %3121 }
0x150d   :  { %1528 = vrot.lane.b32.xlu1 %v3122_v26, %s3197_s22 }
0x157f   :  { %v1529_v29 = vpop.permute.xlu1 %1528 }
0x1580   :  { %v1531_v31 = vmul.f32 %v1529_v29, %v1526_v28 }
0x1582   :  { %v3559_v34 = vadd.f32 %v1532_v30, %v1531_v31 }
0x1584   :  { %1535 = vrot.lane.b32.xlu0 %v3559_v34, %s3197_s22 }
0x15f6   :  { %v1536_v36 = vpop.permute.xlu0 %1535 }
0x15f7   :  { %2976 = vmatmul.mubr.msk.f32.vlgmr.msra.gmra.mxu1 %vm61_vm1, %v1536_v36 }
0x15f8   :  { %3014 = vmatpush3.msra.mxu1 %v1735_v35  ;;  %3017 = vmatprep.mubr.msk.f32.mxu1 %vm3194_vm0, %v3193_v1 }
0x15f9   :  { %3015 = vmatprep.subr.mxu1 %v3193_v1 }
0x15fa   :  { %3016 = vmatpush3.msra.mxu1 %v1734_v21 }
0x15fb   :  { %3018 = vmatmul.mubr.msk.f32.vlgmr.msra.gmra.mxu1 %vm61_vm1, %v1536_v36  ;;  %3020 = vmatprep.subr.mxu1 %v3193_v1 }
0x15fc   :  { %3022 = vmatprep.mubr.msk.f32.mxu1 %vm3194_vm0, %v3193_v1  ;;  %3021 = vmatpush3.msra.mxu1 %v3580_v37 }
0x15fd   :  { %3025 = vmatprep.subr.mxu1 %v3193_v1 }
0x16b7   :  { %v3584_v38 = vpop.f32.mrf.mxu1 }
0x16b9   :  { %v2977_v39 = vpop.f32.mrf.mxu1 }
0x16bb   :  { %v1809_v43 = vpop.f32.mrf.mxu1 }
0x16bc   :  { %v1810_v45 = vadd.f32 %v2751_v40, %v1809_v43 }
0x16bd   :  { %v3019_v46 = vpop.f32.mrf.mxu1 }
0x16be   :  { %vm1813_vm3 = vcmp.gt.f32.partialorder %v1810_v45, 0.0  ;;  %v1814_v47 = vmul.f32 0.2, %v1810_v45 }
0x16c0   :  { %v1815_v48 = vsel %vm1813_vm3, %v1810_v45, %v1814_v47 }
0x16c1   :  { %3023 = vmatmul.mubr.msk.f32.vlgmr.msra.gmra.mxu1 %vm1824_vm4, %v1815_v48 }
0x16c2   :  { %3026 = vmatpush3.msra.mxu1 %v3580_v37  ;;  %3027 = vmatprep.mubr.msk.f32.mxu1 %vm3194_vm0, %v3193_v1 }
0x16c3   :  { %3030 = vmatprep.subr.mxu1 %v3193_v1 }
0x1781   :  { %v1894_v6 = vpop.f32.mrf.mxu1 }
0x1782   :  { %v1895_v50 = vadd.f32 %v3597_v49, %v1894_v6  ;;  %v751_v6 = vadd.f32 %v3604_v54, %v3446_v27 }
0x1783   :  { %v3024_v52 = vpop.f32.mrf.mxu1 }
0x1784   :  { %1906 = vrot.lane.b32.xlu1 %v1895_v50, %s3197_s22  ;;  %v1898_v56 = vadd.f32 %v1895_v50, %v409_v55 }
0x1786   :  { %v1899_v57 = vsub.f32 0.0, %v1898_v56 }
0x1788   :  { %v1900_v58 = vmul.f32 1.442695, %v1899_v57 }
0x178a   :  { %3123 = vpow2.f32 %v1900_v58 }
0x1797   :  { %v3124_v59 = vpop.eup %3123 }
0x1798   :  { %v1902_v60 = vadd.f32 1.0, %v3124_v59 }
0x179a   :  { %3125 = vrcp.f32 %v1902_v60 }
0x17a7   :  { %v3126_v61 = vpop.eup %3125 }
0x17a8   :  { %v1916_v10 = vsub.f32 1.0, %v3126_v61 }
0x17f6   :  { %v1907_v63 = vpop.permute.xlu1 %1906 }
0x17f7   :  { %v1909_v2 = vmul.f32 %v3126_v61, %v1907_v63 }
0x17f9   :  { %1911 = vrot.lane.b32.xlu0 %v1909_v2, %s3198_s23 }
0x17fd   :  { %1922 = vrot.lane.b32.xlu0 %v1815_v48, %s3199_s12 }
0x186b   :  { %v1912_v3 = vpop.permute.xlu0 %1911 }
0x186c   :  { %v1914_v5 = vadd.f32 %v1912_v3, %v409_v55 }
0x186e   :  { %3127 = vtanh.f32 %v1914_v5 }
0x186f   :  { %v1923_v42 = vpop.permute.xlu0 %1922 }
0x1870   :  { %v1925_v12 = vmul.f32 %v3126_v61, %v1923_v42 }
0x187b   :  { %v3128_v8 = vpop.eup %3127 }
0x187c   :  { %1918 = vrot.lane.b32.xlu1 %v3128_v8, %s3200_s11 }
0x18ee   :  { %v1919_v11 = vpop.permute.xlu1 %1918 }
0x18ef   :  { %v1921_v13 = vmul.f32 %v1919_v11, %v1916_v10 }
0x18f1   :  { %v3611_v32 = vadd.f32 %v1925_v12, %v1921_v13 }
0x18f3   :  { %1939 = vrot.lane.b32.xlu1 %v3611_v32, %s3200_s11 }
0x1965   :  { %v1940_v15 = vpop.permute.xlu1 %1939 }
0x1966   :  { %3028 = vmatmul.mubr.msk.f32.vlgmr.msra.gmra.mxu1 %vm1824_vm4, %v1940_v15  ;;  %v922_v15 = vadd.f32 %v3604_v54, %v3473_v53 }
0x1967   :  { %3031 = vmatpush3.msra.mxu1 %v3580_v37  ;;  %3032 = vmatprep.mubr.msk.f32.mxu1 %vm3194_vm0, %v3193_v1 }
0x1968   :  { %3035 = vmatprep.subr.mxu1 %v3193_v1 }
0x1a26   :  { %v2009_v18 = vpop.f32.mrf.mxu1 }
0x1a27   :  { %v2010_v19 = vadd.f32 %v3597_v49, %v2009_v18 }
0x1a28   :  { %v3029_v20 = vpop.f32.mrf.mxu1 }
0x1a29   :  { %2021 = vrot.lane.b32.xlu0 %v2010_v19, %s3197_s22  ;;  %v2013_v22 = vadd.f32 %v2010_v19, %v580_v33 }
0x1a2b   :  { %v2014_v23 = vsub.f32 0.0, %v2013_v22 }
0x1a2d   :  { %v2015_v24 = vmul.f32 1.442695, %v2014_v23 }
0x1a2f   :  { %3129 = vpow2.f32 %v2015_v24 }
0x1a3c   :  { %v3130_v16 = vpop.eup %3129 }
0x1a3d   :  { %v2017_v26 = vadd.f32 1.0, %v3130_v16 }
0x1a3f   :  { %3131 = vrcp.f32 %v2017_v26 }
0x1a4c   :  { %v3132_v28 = vpop.eup %3131 }
0x1a4d   :  { %v2031_v21 = vsub.f32 1.0, %v3132_v28  ;;  %v2037_v39 = vmul.f32 %v3132_v28, %v3611_v32 }
0x1a9b   :  { %v2022_v29 = vpop.permute.xlu0 %2021 }
0x1a9c   :  { %v2024_v30 = vmul.f32 %v3132_v28, %v2022_v29 }
0x1a9e   :  { %2026 = vrot.lane.b32.xlu1 %v2024_v30, %s3198_s23 }
0x1b10   :  { %v2027_v31 = vpop.permute.xlu1 %2026 }
0x1b11   :  { %v2029_v35 = vadd.f32 %v2027_v31, %v580_v33 }
0x1b13   :  { %3133 = vtanh.f32 %v2029_v35 }
0x1b20   :  { %v3134_v36 = vpop.eup %3133 }
0x1b21   :  { %2033 = vrot.lane.b32.xlu0 %v3134_v36, %s3200_s11 }
0x1b93   :  { %v2034_v0 = vpop.permute.xlu0 %2033 }
0x1b94   :  { %v2036_v40 = vmul.f32 %v2034_v0, %v2031_v21 }
0x1b96   :  { %v3627_v43 = vadd.f32 %v2037_v39, %v2036_v40 }
0x1b98   :  { %2047 = vrot.lane.b32.xlu1 %v3627_v43, %s3200_s11 }
0x1c0a   :  { %v2048_v45 = vpop.permute.xlu1 %2047 }
0x1c0b   :  { %3033 = vmatmul.mubr.msk.f32.vlgmr.msra.gmra.mxu1 %vm1824_vm4, %v2048_v45  ;;  %v1093_v45 = vadd.f32 %v3604_v54, %v3500_v17 }
0x1c0c   :  { %3036 = vmatpush3.msra.mxu1 %v3580_v37  ;;  %3037 = vmatprep.mubr.msk.f32.mxu1 %vm3194_vm0, %v3193_v1 }
0x1c0d   :  { %3040 = vmatprep.subr.mxu1 %v3193_v1 }
0x1ccb   :  { %v2117_v46 = vpop.f32.mrf.mxu1 }
0x1ccc   :  { %v2118_v47 = vadd.f32 %v3597_v49, %v2117_v46 }
0x1ccd   :  { %v3034_v48 = vpop.f32.mrf.mxu1 }
0x1cce   :  { %2129 = vrot.lane.b32.xlu0 %v2118_v47, %s3197_s22  ;;  %v2121_v50 = vadd.f32 %v2118_v47, %v751_v6 }
0x1cd0   :  { %v2122_v52 = vsub.f32 0.0, %v2121_v50 }
0x1cd2   :  { %v2123_v55 = vmul.f32 1.442695, %v2122_v52 }
0x1cd4   :  { %3135 = vpow2.f32 %v2123_v55 }
0x1ce1   :  { %v3136_v56 = vpop.eup %3135 }
0x1ce2   :  { %v2125_v57 = vadd.f32 1.0, %v3136_v56 }
0x1ce4   :  { %3137 = vrcp.f32 %v2125_v57 }
0x1cf1   :  { %v3138_v58 = vpop.eup %3137 }
0x1cf2   :  { %v2139_v3 = vsub.f32 1.0, %v3138_v58  ;;  %v2145_v5 = vmul.f32 %v3138_v58, %v3627_v43 }
0x1d40   :  { %v2130_v59 = vpop.permute.xlu0 %2129 }
0x1d41   :  { %v2132_v60 = vmul.f32 %v3138_v58, %v2130_v59 }
0x1d43   :  { %2134 = vrot.lane.b32.xlu1 %v2132_v60, %s3198_s23 }
0x1db5   :  { %v2135_v61 = vpop.permute.xlu1 %2134 }
0x1db6   :  { %v2137_v63 = vadd.f32 %v2135_v61, %v751_v6 }
0x1db8   :  { %3139 = vtanh.f32 %v2137_v63 }
0x1dc5   :  { %v3140_v2 = vpop.eup %3139 }
0x1dc6   :  { %2141 = vrot.lane.b32.xlu0 %v3140_v2, %s3200_s11 }
0x1e38   :  { %v2142_v27 = vpop.permute.xlu0 %2141 }
0x1e39   :  { %v2144_v8 = vmul.f32 %v2142_v27, %v2139_v3 }
0x1e3b   :  { %v3643_v42 = vadd.f32 %v2145_v5, %v2144_v8 }
0x1e3d   :  { %2158 = vrot.lane.b32.xlu1 %v3643_v42, %s3200_s11 }
0x1eaf   :  { %v2159_v10 = vpop.permute.xlu1 %2158 }
0x1eb0   :  { %3038 = vmatmul.mubr.msk.f32.vlgmr.msra.gmra.mxu1 %vm1824_vm4, %v2159_v10  ;;  %v1264_v10 = vadd.f32 %v3604_v54, %v3527_v4 }
0x1eb1   :  { %3041 = vmatpush3.msra.mxu1 %v3580_v37  ;;  %3042 = vmatprep.mubr.msk.f32.mxu1 %vm3194_vm0, %v3193_v1 }
0x1eb2   :  { %3045 = vmatprep.subr.mxu1 %v3193_v1 }
0x1f70   :  { %v2228_v11 = vpop.f32.mrf.mxu1 }
0x1f71   :  { %v2229_v12 = vadd.f32 %v3597_v49, %v2228_v11 }
0x1f72   :  { %v3039_v13 = vpop.f32.mrf.mxu1 }
0x1f73   :  { %2240 = vrot.lane.b32.xlu0 %v2229_v12, %s3197_s22  ;;  %v2232_v18 = vadd.f32 %v2229_v12, %v922_v15 }
0x1f75   :  { %v2233_v19 = vsub.f32 0.0, %v2232_v18 }
0x1f77   :  { %v2234_v20 = vmul.f32 1.442695, %v2233_v19 }
0x1f79   :  { %3141 = vpow2.f32 %v2234_v20 }
0x1f86   :  { %v3142_v33 = vpop.eup %3141 }
0x1f87   :  { %v2236_v22 = vadd.f32 1.0, %v3142_v33 }
0x1f89   :  { %3143 = vrcp.f32 %v2236_v22 }
0x1f96   :  { %v3144_v23 = vpop.eup %3143 }
0x1f97   :  { %v2250_v30 = vsub.f32 1.0, %v3144_v23  ;;  %v2256_v31 = vmul.f32 %v3144_v23, %v3643_v42 }
0x1fe5   :  { %v2241_v24 = vpop.permute.xlu0 %2240 }
0x1fe6   :  { %v2243_v16 = vmul.f32 %v3144_v23, %v2241_v24 }
0x1fe8   :  { %2245 = vrot.lane.b32.xlu1 %v2243_v16, %s3198_s23 }
0x205a   :  { %v2246_v26 = vpop.permute.xlu1 %2245 }
0x205b   :  { %v2248_v28 = vadd.f32 %v2246_v26, %v922_v15 }
0x205d   :  { %3145 = vtanh.f32 %v2248_v28 }
0x206a   :  { %v3146_v29 = vpop.eup %3145 }
0x206b   :  { %2252 = vrot.lane.b32.xlu0 %v3146_v29, %s3200_s11 }
0x20dd   :  { %v2253_v53 = vpop.permute.xlu0 %2252 }
0x20de   :  { %v2255_v35 = vmul.f32 %v2253_v53, %v2250_v30 }
0x20e0   :  { %v3659_v36 = vadd.f32 %v2256_v31, %v2255_v35 }
0x20e2   :  { %2269 = vrot.lane.b32.xlu1 %v3659_v36, %s3200_s11 }
0x2154   :  { %v2270_v21 = vpop.permute.xlu1 %2269 }
0x2155   :  { %3043 = vmatmul.mubr.msk.f32.vlgmr.msra.gmra.mxu1 %vm1824_vm4, %v2270_v21  ;;  %v1435_v21 = vadd.f32 %v3604_v54, %v3550_v9  ;;  %v1656_v9 = vld [vmem:[%s3848_s13 + $0x78] sm:$0xff] }
0x2156   :  { %3046 = vmatpush3.msra.mxu1 %v3580_v37  ;;  %3047 = vmatprep.mubr.msk.f32.mxu1 %vm3194_vm0, %v3193_v1 }
0x2157   :  { %3050 = vmatprep.subr.mxu1 %v3193_v1  ;;  %2979 = vmatpush3.msra.mxu0 %v1656_v9 }
0x2158   :  { %2980 = vmatprep.subr.mxu0 %v3193_v1 }
0x2215   :  { %v2339_v0 = vpop.f32.mrf.mxu1 }
0x2216   :  { %v2340_v39 = vadd.f32 %v3597_v49, %v2339_v0 }
0x2217   :  { %v3044_v40 = vpop.f32.mrf.mxu1 }
0x2218   :  { %2351 = vrot.lane.b32.xlu0 %v2340_v39, %s3197_s22  ;;  %v2343_v46 = vadd.f32 %v2340_v39, %v1093_v45 }
0x221a   :  { %v2344_v47 = vsub.f32 0.0, %v2343_v46 }
0x221c   :  { %v2345_v48 = vmul.f32 1.442695, %v2344_v47 }
0x221e   :  { %3147 = vpow2.f32 %v2345_v48 }
0x222b   :  { %v3148_v6 = vpop.eup %3147 }
0x222c   :  { %v2347_v50 = vadd.f32 1.0, %v3148_v6 }
0x222e   :  { %3149 = vrcp.f32 %v2347_v50  ;;  %v1655_v50 = vld [vmem:[%s3848_s13 + $0x70] sm:$0xff] }
0x222f   :  { %2981 = vmatpush3.msra.mxu0 %v1655_v50 }
0x2230   :  { %2982 = vmatprep.subr.mxu0 %v3193_v1 }
0x223b   :  { %v3150_v52 = vpop.eup %3149 }
0x223c   :  { %v2361_v60 = vsub.f32 1.0, %v3150_v52  ;;  %v2367_v61 = vmul.f32 %v3150_v52, %v3659_v36 }
0x228a   :  { %v2352_v55 = vpop.permute.xlu0 %2351 }
0x228b   :  { %v2354_v56 = vmul.f32 %v3150_v52, %v2352_v55  ;;  %v1651_v52 = vld [vmem:[%s3848_s13 + $0x50] sm:$0xff]  ;;  %v1650_v55 = vld [vmem:[%s3848_s13 + $0x48] sm:$0xff] }
0x228d   :  { %2356 = vrot.lane.b32.xlu1 %v2354_v56, %s3198_s23  ;;  %v1649_v56 = vld [vmem:[%s3848_s13 + $0x40] sm:$0xff] }
0x22ff   :  { %v2357_v57 = vpop.permute.xlu1 %2356 }
0x2300   :  { %v2359_v58 = vadd.f32 %v2357_v57, %v1093_v45  ;;  %v1648_v57 = vld [vmem:[%s3848_s13 + $0x38] sm:$0xff] }
0x2302   :  { %3151 = vtanh.f32 %v2359_v58 }
0x230f   :  { %v3152_v59 = vpop.eup %3151 }
0x2310   :  { %2363 = vrot.lane.b32.xlu0 %v3152_v59, %s3200_s11 }
0x2382   :  { %v2364_v17 = vpop.permute.xlu0 %2363 }
0x2383   :  { %v2366_v63 = vmul.f32 %v2364_v17, %v2361_v60  ;;  %v1647_v60 = vld [vmem:[%s3848_s13 + $0x30] sm:$0xff]  ;;  %v1646_v17 = vld [vmem:[%s3848_s13 + $0x28] sm:$0xff] }
0x2385   :  { %v3675_v2 = vadd.f32 %v2367_v61, %v2366_v63  ;;  %v1645_v61 = vld [vmem:[%s3848_s13 + $0x20] sm:$0xff]  ;;  %v1644_v63 = vld [vmem:[%s3848_s13 + $0x18] sm:$0xff] }
0x2387   :  { %2380 = vrot.lane.b32.xlu1 %v3675_v2, %s3200_s11 }
0x23f9   :  { %v2381_v3 = vpop.permute.xlu1 %2380 }
0x23fa   :  { %3048 = vmatmul.mubr.msk.f32.vlgmr.msra.gmra.mxu1 %vm1824_vm4, %v2381_v3  ;;  %v1643_v3 = vld [vmem:[%s3848_s13 + $0x10] sm:$0xff] }
0x23fb   :  { %3051 = vmatpush3.msra.mxu1 %v3580_v37  ;;  %3052 = vmatprep.mubr.msk.f32.mxu1 %vm3194_vm0, %v3193_v1 }
0x24ba   :  { %v2450_v27 = vpop.f32.mrf.mxu1 }
0x24bb   :  { %v2451_v5 = vadd.f32 %v3597_v49, %v2450_v27  ;;  %v1642_v27 = vld [vmem:[%s3848_s13 + $0x8] sm:$0xff] }
0x24bc   :  { %v3049_v8 = vpop.f32.mrf.mxu1 }
0x24bd   :  { %2462 = vrot.lane.b32.xlu0 %v2451_v5, %s3197_s22  ;;  %v2454_v11 = vadd.f32 %v2451_v5, %v1264_v10  ;;  %v1641_v5 = vld [vmem:[%s3848_s13] sm:$0xff] }
0x24bf   :  { %v2455_v12 = vsub.f32 0.0, %v2454_v11 }
0x24c1   :  { %v2456_v13 = vmul.f32 1.442695, %v2455_v12 }
0x24c3   :  { %3153 = vpow2.f32 %v2456_v13 }
0x24d0   :  { %v3154_v15 = vpop.eup %3153 }
0x24d1   :  { %v2458_v18 = vadd.f32 1.0, %v3154_v15 }
0x24d3   :  { %3155 = vrcp.f32 %v2458_v18 }
0x24e0   :  { %v3156_v19 = vpop.eup %3155 }
0x24e1   :  { %v2472_v16 = vsub.f32 1.0, %v3156_v19  ;;  %v2478_v26 = vmul.f32 %v3156_v19, %v3675_v2 }
0x252f   :  { %v2463_v20 = vpop.permute.xlu0 %2462 }
0x2530   :  { %v2465_v33 = vmul.f32 %v3156_v19, %v2463_v20 }
0x2532   :  { %2467 = vrot.lane.b32.xlu1 %v2465_v33, %s3198_s23 }
0x25a4   :  { %v2468_v22 = vpop.permute.xlu1 %2467 }
0x25a5   :  { %v2470_v23 = vadd.f32 %v2468_v22, %v1264_v10 }
0x25a7   :  { %3157 = vtanh.f32 %v2470_v23 }
0x25b4   :  { %v3158_v24 = vpop.eup %3157 }
0x25b5   :  { %2474 = vrot.lane.b32.xlu0 %v3158_v24, %s3200_s11 }
0x2627   :  { %v2475_v4 = vpop.permute.xlu0 %2474 }
0x2628   :  { %v2477_v28 = vmul.f32 %v2475_v4, %v2472_v16 }
0x262a   :  { %v3690_v29 = vadd.f32 %v2478_v26, %v2477_v28 }
0x262c   :  { %2491 = vrot.lane.b32.xlu1 %v3690_v29, %s3200_s11 }
0x269e   :  { %v2492_v30 = vpop.permute.xlu1 %2491 }
0x269f   :  { %3053 = vmatmul.mubr.msk.f32.vlgmr.msra.gmra.mxu1 %vm1824_vm4, %v2492_v30 }
0x275f   :  { %v2561_v53 = vpop.f32.mrf.mxu1 }
0x2760   :  { %v2562_v31 = vadd.f32 %v3597_v49, %v2561_v53 }
0x2761   :  { %v3054_v35 = vpop.f32.mrf.mxu1 }
0x2762   :  { %2573 = vrot.lane.b32.xlu0 %v2562_v31, %s3197_s22  ;;  %v2565_v0 = vadd.f32 %v2562_v31, %v1435_v21  ;;  %v2750_v31 = vld [vmem:[%s3849_s14] ss:$0 sm:$0xff]  ;;  %s3205_s14 = smov 88  }
0x2764   :  { %v2566_v39 = vsub.f32 0.0, %v2565_v0 }
0x2766   :  { %v2567_v40 = vmul.f32 1.442695, %v2566_v39 }
0x2768   :  { %3159 = vpow2.f32 %v2567_v40 }
0x2775   :  { %v3160_v45 = vpop.eup %3159 }
0x2776   :  { %v2569_v46 = vadd.f32 1.0, %v3160_v45 }
0x2778   :  { %3161 = vrcp.f32 %v2569_v46 }
0x2785   :  { %v3699_v47 = vpop.eup %3161 }
0x2786   :  { %v2583_v11 = vsub.f32 1.0, %v3699_v47  ;;  %v2589_v13 = vmul.f32 %v3699_v47, %v3690_v29 }
0x27d4   :  { %v2574_v48 = vpop.permute.xlu0 %2573 }
0x27d5   :  { %v2576_v6 = vmul.f32 %v3699_v47, %v2574_v48 }
0x27d7   :  { %2578 = vrot.lane.b32.xlu1 %v2576_v6, %s3198_s23 }
0x27db   :  { %1610 = vrot.lane.b32.xlu1 %v3428_v25, %s3198_s23  ;;  %v1654_v25 = vld [vmem:[%s3848_s13 + $0x68] sm:$0xff] }
0x27dc   :  { %2983 = vmatpush3.msra.mxu0 %v1654_v25 }
0x27dd   :  { %2984 = vmatprep.subr.mxu0 %v3193_v1 }
0x27df   :  { %1616 = vrot.lane.b32.xlu1 %v3482_v14, %s3201_s30  ;;  %v1653_v14 = vld [vmem:[%s3848_s13 + $0x60] sm:$0xff] }
0x27e0   :  { %2985 = vmatpush3.msra.mxu0 %v1653_v14 }
0x27e1   :  { %2986 = vmatprep.subr.mxu0 %v3193_v1 }
0x27e3   :  { %1622 = vrot.lane.b32.xlu1 %v3536_v7, %s3202_s16  ;;  %v1652_v7 = vld [vmem:[%s3848_s13 + $0x58] sm:$0xff] }
0x27e4   :  { %2987 = vmatpush3.msra.mxu0 %v1652_v7 }
0x27e5   :  { %2988 = vmatprep.subr.mxu0 %v3193_v1 }
0x27e6   :  { %2989 = vmatpush3.msra.mxu0 %v1651_v52 }
0x27e7   :  { %2990 = vmatprep.subr.mxu0 %v3193_v1 }
0x27e8   :  { %2991 = vmatpush3.msra.mxu0 %v1650_v55 }
0x27e9   :  { %2992 = vmatprep.subr.mxu0 %v3193_v1 }
0x27ea   :  { %2993 = vmatpush3.msra.mxu0 %v1649_v56 }
0x27eb   :  { %2994 = vmatprep.subr.mxu0 %v3193_v1 }
0x27ec   :  { %2995 = vmatpush3.msra.mxu0 %v1648_v57 }
0x27ed   :  { %2996 = vmatprep.subr.mxu0 %v3193_v1 }
0x27ee   :  { %2997 = vmatpush3.msra.mxu0 %v1647_v60 }
0x27ef   :  { %2998 = vmatprep.subr.mxu0 %v3193_v1 }
0x27f0   :  { %2999 = vmatpush3.msra.mxu0 %v1646_v17 }
0x27f1   :  { %3000 = vmatprep.subr.mxu0 %v3193_v1 }
0x27f2   :  { %3001 = vmatpush3.msra.mxu0 %v1645_v61 }
0x27f3   :  { %3002 = vmatprep.subr.mxu0 %v3193_v1 }
0x27f4   :  { %3003 = vmatpush3.msra.mxu0 %v1644_v63 }
0x27f5   :  { %3004 = vmatprep.subr.mxu0 %v3193_v1 }
0x27f6   :  { %3005 = vmatpush3.msra.mxu0 %v1643_v3 }
0x27f7   :  { %3006 = vmatprep.subr.mxu0 %v3193_v1 }
0x27f8   :  { %3007 = vmatpush3.msra.mxu0 %v1642_v27 }
0x27f9   :  { %3008 = vmatprep.subr.mxu0 %v3193_v1 }
0x27fa   :  { %3009 = vmatpush3.msra.mxu0 %v1641_v5 }
0x27fb   :  { %3055 = vmatprep.subr.mxu0 %v3193_v1 }
0x2849   :  { %v2579_v58 = vpop.permute.xlu1 %2578 }
0x284a   :  { %v2581_v59 = vadd.f32 %v2579_v58, %v1435_v21 }
0x284c   :  { %3163 = vtanh.f32 %v2581_v59 }
0x284d   :  { %v1611_v10 = vpop.permute.xlu1 %1610 }
0x2851   :  { %v1617_v20 = vpop.permute.xlu1 %1616 }
0x2855   :  { %v1623_v24 = vpop.permute.xlu1 %1622 }
0x2859   :  { %v3164_v8 = vpop.eup %3163 }
0x285a   :  { %2585 = vrot.lane.b32.xlu0 %v3164_v8, %s3200_s11 }
0x285e   :  { %1613 = vrot.lane.b32.xlu0 %v3455_v51, %s3196_s8  ;;  %v1628_v51 = vsel %vm61_vm1, %v3375_v41, %v3401_v62 }
0x2862   :  { %1619 = vrot.lane.b32.xlu0 %v3509_v44, %s3203_s0  ;;  %v1630_v44 = vsel %vm1629_vm5, %v1628_v51, %v1611_v10 }
0x2866   :  { %1625 = vrot.lane.b32.xlu0 %v3559_v34, %s3195_s6 }
0x28cc   :  { %v2586_v12 = vpop.permute.xlu0 %2585 }
0x28cd   :  { %v2588_v15 = vmul.f32 %v2586_v12, %v2583_v11 }
0x28cf   :  { %v3784_v18 = vadd.f32 %v2589_v13, %v2588_v15 }
0x28d0   :  { %v1614_v19 = vpop.permute.xlu0 %1613 }
0x28d1   :  { %v1632_v34 = vsel %vm1631_vm6, %v1630_v44, %v1614_v19  ;;  %2602 = vrot.lane.b32.xlu1 %v3784_v18, %s3200_s11 }
0x28d2   :  { %v1634_v22 = vsel %vm1633_vm7, %v1632_v34, %v1617_v20 }
0x28d4   :  { %v1620_v33 = vpop.permute.xlu0 %1619 }
0x28d5   :  { %v1636_v23 = vsel %vm1635_vm8, %v1634_v22, %v1620_v33 }
0x28d6   :  { %v1638_v4 = vsel %vm1637_vm9, %v1636_v23, %v1623_v24 }
0x28d8   :  { %v1626_v16 = vpop.permute.xlu0 %1625 }
0x28d9   :  { %v1640_v41 = vsel %vm1639_vm10, %v1638_v4, %v1626_v16 }
0x28da   :  { %3011 = vmatmul.mubr.f32.vlgmr.msra.gmra.mxu0 %v1640_v41 }
0x28db   :  { %3056 = vmatpush3.msra.mxu0 %v3580_v37  ;;  %3057 = vmatprep.mubr.msk.f32.mxu0 %vm3194_vm0, %v3193_v1  ;;  %v1606_v1 = vadd.f32 %v3604_v54, %v3584_v38 }
0x2943   :  { %v2603_v62 = vpop.permute.xlu1 %2602 }
0x2944   :  { %3058 = vmatmul.mubr.msk.f32.vlgmr.msra.gmra.mxu0 %vm1824_vm4, %v2603_v62 }
0x299a   :  { %v1730_v26 = vpop.f32.mrf.mxu0 }
0x299b   :  { %v1731_v21 = vadd.f32 %v2750_v31, %v1730_v26 }
0x299c   :  { %v3012_v28 = vpop.f32.mrf.mxu0 }
0x299d   :  { %v2039_v38 = vadd.f32 %v3627_v43, %v1731_v21 }
0x2a04   :  { %v2672_v30 = vpop.f32.mrf.mxu0 }
0x2a05   :  { %v2673_v53 = vadd.f32 %v3597_v49, %v2672_v30 }
0x2a06   :  { %v3059_v35 = vpop.f32.mrf.mxu0 }
0x2a07   :  { %2684 = vrot.lane.b32.xlu0 %v2673_v53, %s3197_s22  ;;  %v2676_v37 = vadd.f32 %v2673_v53, %v1606_v1 }
0x2a09   :  { %v2677_v0 = vsub.f32 0.0, %v2676_v37 }
0x2a0b   :  { %2147 = vrot.lane.b32.xlu0 %v1731_v21, %s3200_s11  ;;  %v2678_v39 = vmul.f32 1.442695, %v2677_v0 }
0x2a0d   :  { %3165 = vpow2.f32 %v2678_v39 }
0x2a0f   :  { %2369 = vrot.lane.b32.xlu0 %v1731_v21, %s3204_s26 }
0x2a1a   :  { %v3166_v49 = vpop.eup %3165 }
0x2a1b   :  { %v2680_v40 = vadd.f32 1.0, %v3166_v49 }
0x2a1d   :  { %3167 = vrcp.f32 %v2680_v40 }
0x2a2a   :  { %v3168_v45 = vpop.eup %3167 }
0x2a2b   :  { %v2694_v60 = vsub.f32 1.0, %v3168_v45 }
0x2a79   :  { %v2685_v46 = vpop.permute.xlu0 %2684 }
0x2a7a   :  { %v2687_v47 = vmul.f32 %v3168_v45, %v2685_v46 }
0x2a7c   :  { %2689 = vrot.lane.b32.xlu1 %v2687_v47, %s3198_s23 }
0x2a7d   :  { %v2148_v55 = vpop.permute.xlu0 %2147 }
0x2a7e   :  { %v2150_v56 = vadd.f32 %v2148_v55, %v3643_v42 }
0x2a80   :  { %1928 = vrot.lane.b32.xlu1 %v1731_v21, %s3199_s12 }
0x2a84   :  { %2258 = vrot.lane.b32.xlu1 %v1731_v21, %s3197_s22 }
0x2a88   :  { %2480 = vrot.lane.b32.xlu1 %v1731_v21, %s3195_s6  ;;  %s3206_s6 = smov [#allocation2]  }
0x2a89   :  { %s2717_s22 = sshll.u32 %s3206_s6, 4  ;;  %s2718_s22 = int_to_ptr.vmem [resolvable:$true] %s2717_s22 }
0x2a8a   :  { %s3171_s23 = scalar_lea.vmem %s2718_s22, 256  ;;  %p3176_p1 = scmp.lt.s32.totalorder %s2718_s22, %s2718_s22 }
0x2a8b   :  { %p3172_p0 = scmp.ne.s32.totalorder %s2718_s22, %s3171_s23  ;;  %p3177_p2 = scmp.lt.s32.totalorder %s3171_s23, %s3171_s23 }
0x2a8c   :  { %2702 = vrot.lane.b32.xlu1 %v1731_v21, %s3202_s16 }
0x2a8d   :  { %p3178_p3 = por %p3177_p2, %p3176_p1 }
0x2a8f   :  { %p3179_p4 = pnand %p3178_p3, %p3172_p0 }
0x2a90   :  { %2041 = vrot.lane.b32.xlu1 %v2039_v38, %s3200_s11 }
0x2aee   :  { %v2690_v54 = vpop.permute.xlu1 %2689 }
0x2aef   :  { %v2692_v48 = vadd.f32 %v2690_v54, %v1606_v1 }
0x2af1   :  { %3169 = vtanh.f32 %v2692_v48 }
0x2af2   :  { %v1929_v6 = vpop.permute.xlu1 %1928 }
0x2af6   :  { %v2259_v9 = vpop.permute.xlu1 %2258 }
0x2af7   :  { %v2261_v50 = vadd.f32 %v2259_v9, %v3659_v36  ;;  %v1931_v36 = vadd.f32 %v1929_v6, %v3611_v32  ;;  %v2700_v32 = vmul.f32 %v3168_v45, %v3784_v18 }
0x2af9   :  { %2263 = vrot.lane.b32.xlu1 %v2261_v50, %s3200_s11 }
0x2afa   :  { %v2481_v25 = vpop.permute.xlu1 %2480 }
0x2afb   :  { %v2483_v14 = vadd.f32 %v2481_v25, %v3690_v29  ;;  %v2370_v29 = vpop.permute.xlu0 %2369 }
0x2afc   :  { %v2372_v57 = vadd.f32 %v2370_v29, %v3675_v2 }
0x2afd   :  { %2485 = vrot.lane.b32.xlu1 %v2483_v14, %s3200_s11 }
0x2afe   :  { %v3170_v7 = vpop.eup %3169  ;;  %v2703_v52 = vpop.permute.xlu1 %2702 }
0x2aff   :  { %2696 = vrot.lane.b32.xlu0 %v3170_v7, %s3200_s11 }
0x2b02   :  { %v2042_v43 = vpop.permute.xlu1 %2041 }
0x2b03   :  { %2045 = vst.msk [vmem:[#allocation2 + $0x2] sm:$0x3] %vm1936_vm11, %v2042_v43  ;;  %2591 = vrot.lane.b32.xlu0 %v1731_v21, %s3205_s14 }
0x2b07   :  { %1933 = vrot.lane.b32.xlu0 %v1931_v36, %s3200_s11 }
0x2b0b   :  { %2152 = vrot.lane.b32.xlu0 %v2150_v56, %s3200_s11 }
0x2b0f   :  { %2374 = vrot.lane.b32.xlu0 %v2372_v57, %s3200_s11 }
0x2b6b   :  { %v2264_v58 = vpop.permute.xlu1 %2263 }
0x2b6c   :  { %2267 = vst.msk [vmem:[#allocation2 + $0x6] sm:$0x3] %vm1936_vm11, %v2264_v58 }
0x2b6f   :  { %v2486_v59 = vpop.permute.xlu1 %2485 }
0x2b70   :  { %2489 = vst.msk [vmem:[#allocation2 + $0xa] sm:$0x3] %vm1936_vm11, %v2486_v59 }
0x2b71   :  { %v2697_v17 = vpop.permute.xlu0 %2696 }
0x2b72   :  { %v2699_v61 = vmul.f32 %v2697_v17, %v2694_v60 }
0x2b74   :  { %v2701_v63 = vadd.f32 %v2700_v32, %v2699_v61 }
0x2b75   :  { %v2592_v42 = vpop.permute.xlu0 %2591 }
0x2b76   :  { %v2594_v3 = vadd.f32 %v2592_v42, %v3784_v18  ;;  %v2705_v27 = vadd.f32 %v2703_v52, %v2701_v63 }
0x2b78   :  { %2596 = vrot.lane.b32.xlu0 %v2594_v3, %s3200_s11  ;;  %2707 = vrot.lane.b32.xlu1 %v2705_v27, %s3200_s11 }
0x2b79   :  { %v1934_v2 = vpop.permute.xlu0 %1933 }
0x2b7a   :  { %1937 = vst.msk [vmem:[#allocation2] sm:$0x3] %vm1936_vm11, %v1934_v2 }
0x2b7d   :  { %v2153_v5 = vpop.permute.xlu0 %2152 }
0x2b7e   :  { %2156 = vst.msk [vmem:[#allocation2 + $0x4] sm:$0x3] %vm1936_vm11, %v2153_v5 }
0x2b81   :  { %v2375_v8 = vpop.permute.xlu0 %2374 }
0x2b82   :  { %2378 = vst.msk [vmem:[#allocation2 + $0x8] sm:$0x3] %vm1936_vm11, %v2375_v8 }
0x2bea   :  { %v2597_v10 = vpop.permute.xlu0 %2596  ;;  %v2708_v11 = vpop.permute.xlu1 %2707 }
0x2beb   :  { %2600 = vst.msk [vmem:[#allocation2 + $0xc] sm:$0x3] %vm1936_vm11, %v2597_v10  ;;  %2711 = vst.msk [vmem:[#allocation2 + $0xe] sm:$0x3] %vm1936_vm11, %v2708_v11 }
0x2bec   :  { %3182 = shalt.err (!%p3179_p4)
}
0x2bed   :  { %s3207_s12 = smov 2  }
0x2bee   :  { %2723 = dma.vmem_to_hbm [thread:$0]  %s2718_s22, 256, %s3850_s15, [#allocation3], %s3196_s8, %s3196_s8, %s3207_s12  }
0x2bef   :  { %3191 = dma.done.wait [#allocation3], 256  }
0x2bf0   :  { %3192 = vsyncadd [#allocation3], 4294967040 }
0x2bf1   :  { %2727 = vsyncpa [#allocation3], 1 }

</bundles_post_ra>
